<compile_context>
chip_gen: v5e
topology: v5e:2x2
jax: 0.10.0
libtpu: 0.0.40
codegen_flags: <defaults>
</compile_context>

<pallas_src>
import jax
import jax.numpy as jnp
import numpy as np
from jax import lax
from jax.experimental import pallas as pl
from jax.experimental.pallas import tpu as pltpu


def lstm_recurrence_kernel(xp_ref, lens_ref, whh_ref,
                           mem_ref, hfin_ref, cfin_ref,
                           h_scr, c_scr):
    """One grid step = TT consecutive LSTM time steps for one batch block.

    xp_ref:   (TT, BB, 4H) precomputed x @ W_ih + b   (matmul dtype)
    lens_ref: (BB, 1)      int32 sequence lengths
    whh_ref:  (H, 4H)      hidden->gates weights      (matmul dtype)
    mem_ref:  (TT, BB, H)  memory_bank slab for this time block (f32)
    hfin_ref: (BB, H)      final hidden state
    cfin_ref: (BB, H)      final cell state
    h_scr/c_scr: (BB, H)   f32 state carried across time blocks
    """
    TT = xp_ref.shape[0]
    H = h_scr.shape[-1]
    tb = pl.program_id(1)          # time-block index (inner, "arbitrary" axis)

    @pl.when(tb == 0)
    def _():
        h_scr[...] = jnp.zeros_like(h_scr)
        c_scr[...] = jnp.zeros_like(c_scr)

    lens = lens_ref[...]           # (BB, 1) int32
    t_base = tb * TT

    def step(s, carry):
        h, c = carry
        # Only the recurrent projection runs in the serial loop:
        # (BB, H) @ (H, 4H), bf16 (or f32) operands, f32 accumulation.
        gates = (xp_ref[s].astype(jnp.float32)
                 + jnp.dot(h.astype(whh_ref.dtype), whh_ref[...],
                           preferred_element_type=jnp.float32))
        # PyTorch gate order: i, f, g, o.  H is a multiple of 128 so these
        # slices are lane-tile aligned views.
        i_g = jax.nn.sigmoid(gates[:, 0:H])
        f_g = jax.nn.sigmoid(gates[:, H:2 * H])
        g_g = jnp.tanh(gates[:, 2 * H:3 * H])
        o_g = jax.nn.sigmoid(gates[:, 3 * H:4 * H])
        c_new = f_g * c + i_g * g_g
        h_new = o_g * jnp.tanh(c_new)

        # pack/pad semantics: state only advances while t < length[b];
        # padded memory_bank positions are zero.
        mask = (t_base + s) < lens               # (BB, 1) bool
        h_next = jnp.where(mask, h_new, h)
        c_next = jnp.where(mask, c_new, c)
        mem_ref[s] = jnp.where(mask, h_new, 0.0)
        return h_next, c_next

    h, c = lax.fori_loop(0, TT, step, (h_scr[...], c_scr[...]), unroll=True)
    h_scr[...] = h
    c_scr[...] = c
    # Final-state output blocks have a constant time-block index, so they stay
    # resident in VMEM along the time axis; the value written by the last time
    # block is what lands in HBM.  Writing every block (instead of a pl.when on
    # the last step) keeps correctness independent of writeback timing.
    hfin_ref[...] = h
    cfin_ref[...] = c


def _input_projection(src, emb_table, w_ih, b_ih, b_hh):
    """Embedding lookup + hoisted input projection (plain XLA, f32)."""
    T, B = src.shape
    E = emb_table.shape[1]
    G = w_ih.shape[1]
    emb = jnp.take(emb_table, src, axis=0).astype(jnp.float32)          # (T,B,E)
    bias = (b_ih + b_hh).astype(jnp.float32)
    x_proj = emb.reshape(T * B, E) @ w_ih.astype(jnp.float32) + bias    # one big matmul
    return x_proj.reshape(T, B, G)


def input_feed_rnn_encoder(src, lengths, emb_table, w_ih, w_hh, b_ih, b_hh,
                           *, time_block=16, batch_block=None,
                           matmul_dtype=jnp.bfloat16):
    """src: (T, B) int32 token ids; lengths: (B,) int32.

    Returns (memory_bank [T,B,H], (h_n [1,B,H], c_n [1,B,H])), matching the
    PyTorch module for rnn_type='LSTM', encoder_type='rnn' (unidirectional),
    enc_layers=1, dropout=0.  pack/pad + PermutationWrapper sort/remap are
    reproduced via per-timestep length masking (order-independent).
    """
    # TODO(synk): bidirectional ('brnn') and multi-layer LSTM stacks are not
    # implemented; only the default unidirectional single-layer config is.
    T, B = src.shape
    H = w_hh.shape[0]
    G = 4 * H

    x_proj = _input_projection(src, emb_table, w_ih, b_ih, b_hh)        # (T,B,4H) f32

    # --- pad batch to a sublane multiple and time to the time-block multiple ---
    TT = max(1, min(time_block, T))
    T_pad = pl.cdiv(T, TT) * TT
    B_pad = pl.cdiv(B, 8) * 8
    BB = B_pad
    if batch_block is not None and batch_block < B_pad:
        # Leading grid axis over batch (shards across TensorCores on v7x).
        # Keep batch blocks packed-sublane friendly for bf16 inputs.
        if B_pad % batch_block == 0 and batch_block % 16 == 0:
            BB = batch_block
    nb, nt = B_pad // BB, T_pad // TT

    x_proj_p = jnp.pad(x_proj.astype(matmul_dtype),
                       ((0, T_pad - T), (0, B_pad - B), (0, 0)))
    lens_p = jnp.pad(lengths.astype(jnp.int32),
                     ((0, B_pad - B),)).reshape(B_pad, 1)
    w_hh_m = w_hh.astype(matmul_dtype)

    itemsize = jnp.dtype(matmul_dtype).itemsize
    vmem_bytes = (2 * TT * BB * G * itemsize    # x_proj slab (double-buffered)
                  + 2 * TT * BB * H * 4         # memory_bank slab (double-buffered)
                  + 2 * H * G * itemsize        # W_hh (constant-index block)
                  + 6 * BB * H * 4              # h/c scratch + final-state blocks
                  + (4 << 20))                  # gate temporaries / headroom
    vmem_bytes = int(min(max(vmem_bytes, 8 << 20), 64 << 20))

    mem_p, h_p, c_p = pl.pallas_call(
        lstm_recurrence_kernel,
        out_shape=(jax.ShapeDtypeStruct((T_pad, B_pad, H), jnp.float32),
                   jax.ShapeDtypeStruct((B_pad, H), jnp.float32),
                   jax.ShapeDtypeStruct((B_pad, H), jnp.float32)),
        grid_spec=pltpu.PrefetchScalarGridSpec(
            num_scalar_prefetch=0,
            grid=(nb, nt),                                # (batch, time) blocks
            in_specs=[
                pl.BlockSpec((TT, BB, G), lambda b, t: (t, b, 0)),   # x_proj slab
                pl.BlockSpec((BB, 1), lambda b, t: (b, 0)),          # lengths
                pl.BlockSpec((H, G), lambda b, t: (0, 0)),           # W_hh (resident)
            ],
            out_specs=[
                pl.BlockSpec((TT, BB, H), lambda b, t: (t, b, 0)),   # memory_bank
                pl.BlockSpec((BB, H), lambda b, t: (b, 0)),          # h_n
                pl.BlockSpec((BB, H), lambda b, t: (b, 0)),          # c_n
            ],
            scratch_shapes=[pltpu.VMEM((BB, H), jnp.float32),
                            pltpu.VMEM((BB, H), jnp.float32)]),
        compiler_params=pltpu.CompilerParams(
            dimension_semantics=("parallel", "arbitrary"),  # batch ∥, time serial
            vmem_limit_bytes=vmem_bytes),
    )(x_proj_p, lens_p, w_hh_m)

    memory_bank = mem_p[:T, :B, :]
    h_n = h_p[:B][None, :, :]
    c_n = c_p[:B][None, :, :]
    return memory_bank, (h_n, c_n)


def _reference(x_proj, lengths, w_hh):
    """Pure-JAX (f32) reference built on the same hoisted input projection."""
    T, B, G = x_proj.shape
    H = w_hh.shape[0]

    def step(carry, inp):
        h, c = carry
        xt, t = inp
        gates = xt + h @ w_hh
        i_g = jax.nn.sigmoid(gates[:, :H])
        f_g = jax.nn.sigmoid(gates[:, H:2 * H])
        g_g = jnp.tanh(gates[:, 2 * H:3 * H])
        o_g = jax.nn.sigmoid(gates[:, 3 * H:])
        c_new = f_g * c + i_g * g_g
        h_new = o_g * jnp.tanh(c_new)
        mask = (t < lengths)[:, None]
        h2 = jnp.where(mask, h_new, h)
        c2 = jnp.where(mask, c_new, c)
        return (h2, c2), jnp.where(mask, h_new, 0.0)

    init = (jnp.zeros((B, H), jnp.float32), jnp.zeros((B, H), jnp.float32))
    (h_f, c_f), outs = lax.scan(step, init, (x_proj, jnp.arange(T)))
    return outs, h_f, c_f


if __name__ == "__main__":
    # Small deterministic config: LSTM, unidirectional, 1 layer.
    # H is a lane-tile multiple (128) so gate slices / stores are aligned.
    T, B, V, E, H = 8, 2, 50, 32, 128
    key = jax.random.PRNGKey(0)
    ks = jax.random.split(key, 6)

    emb_table = jax.random.normal(ks[0], (V, E), jnp.float32) * 0.1
    # Stored transposed relative to PyTorch (W_ih: [4H,E] -> [E,4H];
    # W_hh: [4H,H] -> [H,4H]).
    w_ih = jax.random.normal(ks[1], (E, 4 * H), jnp.float32) * 0.1
    w_hh = jax.random.normal(ks[2], (H, 4 * H), jnp.float32) * 0.1
    b_ih = jax.random.normal(ks[3], (4 * H,), jnp.float32) * 0.1
    b_hh = jax.random.normal(ks[4], (4 * H,), jnp.float32) * 0.1

    src = jax.random.randint(ks[5], (T, B), 0, V, dtype=jnp.int32)
    lengths = jnp.array([T, 5], dtype=jnp.int32)   # second sample padded

    # Pure-JAX reference (f32), sharing the hoisted input projection.
    x_proj_ref = _input_projection(src, emb_table, w_ih, b_ih, b_hh)
    ref_mem, ref_h, ref_c = _reference(x_proj_ref, lengths, w_hh)

    # f32 matmul path: tight correctness check.
    mem32, (h32, c32) = input_feed_rnn_encoder(
        src, lengths, emb_table, w_ih, w_hh, b_ih, b_hh,
        matmul_dtype=jnp.float32)
    jax.block_until_ready((mem32, h32, c32))
    np.testing.assert_allclose(np.asarray(mem32), np.asarray(ref_mem),
                               rtol=1e-4, atol=1e-4)
    np.testing.assert_allclose(np.asarray(h32[0]), np.asarray(ref_h),
                               rtol=1e-4, atol=1e-4)
    np.testing.assert_allclose(np.asarray(c32[0]), np.asarray(ref_c),
                               rtol=1e-4, atol=1e-4)

    # bf16-matmul path (default perf config): looser tolerance.
    mem_bf, (h_bf, c_bf) = input_feed_rnn_encoder(
        src, lengths, emb_table, w_ih, w_hh, b_ih, b_hh)
    jax.block_until_ready((mem_bf, h_bf, c_bf))
    np.testing.assert_allclose(np.asarray(mem_bf), np.asarray(ref_mem),
                               rtol=2e-2, atol=2e-2)
    np.testing.assert_allclose(np.asarray(h_bf[0]), np.asarray(ref_h),
                               rtol=2e-2, atol=2e-2)
    np.testing.assert_allclose(np.asarray(c_bf[0]), np.asarray(ref_c),
                               rtol=2e-2, atol=2e-2)

    print("KERNEL_OK")
</pallas_src>

<mosaic_0001>
module attributes {stable_mosaic.version = 11 : i64} {
  func.func @lstm_recurrence_kernel(%arg0: i32, %arg1: i32, %arg2: memref<8x8x512xf32, #tpu.memory_space<vmem>>, %arg3: memref<8x1xi32, #tpu.memory_space<vmem>>, %arg4: memref<128x512xf32, #tpu.memory_space<vmem>>, %arg5: memref<8x8x128xf32, #tpu.memory_space<vmem>>, %arg6: memref<8x128xf32, #tpu.memory_space<vmem>>, %arg7: memref<8x128xf32, #tpu.memory_space<vmem>>, %arg8: memref<8x128xf32, #tpu.memory_space<vmem>>, %arg9: memref<8x128xf32, #tpu.memory_space<vmem>>) attributes {dimension_semantics = [#tpu.dimension_semantics<parallel>, #tpu.dimension_semantics<arbitrary>], iteration_bounds = array<i64: 1, 1>, scalar_prefetch = 0 : i64, scratch_operands = 2 : i64, tpu.core_type = #tpu.core_type<tc>, window_params = [{transform_indices = @transform_0, window_bounds = array<i64: 8, 8, 512>}, {transform_indices = @transform_1, window_bounds = array<i64: 8, 1>}, {pipeline_mode = #tpu.pipeline_mode<synchronous>, transform_indices = @transform_2, window_bounds = array<i64: 128, 512>}, {transform_indices = @transform_3, window_bounds = array<i64: 8, 8, 128>}, {transform_indices = @transform_4, window_bounds = array<i64: 8, 128>}, {transform_indices = @transform_5, window_bounds = array<i64: 8, 128>}]} {
    %c0_i32 = arith.constant 0 : i32
    %0 = arith.cmpi eq, %arg1, %c0_i32 : i32
    %1 = arith.extui %0 : i1 to i32
    %c0_i32_0 = arith.constant 0 : i32
    %2 = arith.cmpi ne, %1, %c0_i32_0 : i32
    scf.if %2 {
      %cst_103 = arith.constant 0.000000e+00 : f32
      %395 = vector.broadcast %cst_103 : f32 to vector<8x128xf32>
      %c0_104 = arith.constant 0 : index
      %c0_105 = arith.constant 0 : index
      %396 = vector.load %arg8[%c0_104, %c0_105] : memref<8x128xf32, #tpu.memory_space<vmem>>, vector<8x128xf32>
      tpu.vector_store %arg8[%c0_104, %c0_105], %395 {strides = array<i32>} : memref<8x128xf32, #tpu.memory_space<vmem>>, vector<8x128xf32>,
      %cst_106 = arith.constant 0.000000e+00 : f32
      %397 = vector.broadcast %cst_106 : f32 to vector<8x128xf32>
      %c0_107 = arith.constant 0 : index
      %c0_108 = arith.constant 0 : index
      %398 = vector.load %arg9[%c0_107, %c0_108] : memref<8x128xf32, #tpu.memory_space<vmem>>, vector<8x128xf32>
      tpu.vector_store %arg9[%c0_107, %c0_108], %397 {strides = array<i32>} : memref<8x128xf32, #tpu.memory_space<vmem>>, vector<8x128xf32>,
    } else {
    }
    %c0 = arith.constant 0 : index
    %c0_1 = arith.constant 0 : index
    %3 = vector.load %arg3[%c0, %c0_1] : memref<8x1xi32, #tpu.memory_space<vmem>>, vector<8x1xi32>
    %c8_i32 = arith.constant 8 : i32
    %4 = arith.muli %arg1, %c8_i32 : i32
    %c0_2 = arith.constant 0 : index
    %c0_3 = arith.constant 0 : index
    %5 = vector.load %arg8[%c0_2, %c0_3] : memref<8x128xf32, #tpu.memory_space<vmem>>, vector<8x128xf32>
    %c0_4 = arith.constant 0 : index
    %c0_5 = arith.constant 0 : index
    %6 = vector.load %arg9[%c0_4, %c0_5] : memref<8x128xf32, #tpu.memory_space<vmem>>, vector<8x128xf32>
    %c0_i32_6 = arith.constant 0 : i32
    %7 = arith.index_cast %c0_i32_6 : i32 to index
    %c0_7 = arith.constant 0 : index
    %c0_8 = arith.constant 0 : index
    %8 = vector.load %arg2[%7, %c0_7, %c0_8] : memref<8x8x512xf32, #tpu.memory_space<vmem>>, vector<1x8x512xf32>
    %9 = vector.shape_cast %8 : vector<1x8x512xf32> to vector<8x512xf32>
    %c0_9 = arith.constant 0 : index
    %c0_10 = arith.constant 0 : index
    %10 = vector.load %arg4[%c0_9, %c0_10] : memref<128x512xf32, #tpu.memory_space<vmem>>, vector<128x512xf32>
    %cst = arith.constant dense<0.000000e+00> : vector<8x512xf32>
    %11 = tpu.matmul %5, %10, %cst {dimension_numbers = #tpu.dot_dimension_numbers<[1], [0], [0], [1], [0, 0, 1, 1], [], []>} : vector<8x128xf32>, vector<128x512xf32>, vector<8x512xf32> -> vector<8x512xf32>
    %12 = arith.addf %9, %11 : vector<8x512xf32>
    %13 = vector.extract_strided_slice %12 {offsets = [0, 0], sizes = [8, 128], strides = [1, 1]} : vector<8x512xf32> to vector<8x128xf32>
    %14 = arith.negf %13 : vector<8x128xf32>
    %15 = math.exp %14 : vector<8x128xf32>
    %cst_11 = arith.constant 1.000000e+00 : f32
    %16 = vector.broadcast %cst_11 : f32 to vector<8x128xf32>
    %17 = arith.addf %16, %15 : vector<8x128xf32>
    %18 = arith.divf %16, %17 : vector<8x128xf32>
    %19 = vector.extract_strided_slice %12 {offsets = [0, 128], sizes = [8, 128], strides = [1, 1]} : vector<8x512xf32> to vector<8x128xf32>
    %20 = arith.negf %19 : vector<8x128xf32>
    %21 = math.exp %20 : vector<8x128xf32>
    %cst_12 = arith.constant 1.000000e+00 : f32
    %22 = vector.broadcast %cst_12 : f32 to vector<8x128xf32>
    %23 = arith.addf %22, %21 : vector<8x128xf32>
    %24 = arith.divf %22, %23 : vector<8x128xf32>
    %25 = vector.extract_strided_slice %12 {offsets = [0, 256], sizes = [8, 128], strides = [1, 1]} : vector<8x512xf32> to vector<8x128xf32>
    %26 = math.tanh %25 : vector<8x128xf32>
    %27 = vector.extract_strided_slice %12 {offsets = [0, 384], sizes = [8, 128], strides = [1, 1]} : vector<8x512xf32> to vector<8x128xf32>
    %28 = arith.negf %27 : vector<8x128xf32>
    %29 = math.exp %28 : vector<8x128xf32>
    %cst_13 = arith.constant 1.000000e+00 : f32
    %30 = vector.broadcast %cst_13 : f32 to vector<8x128xf32>
    %31 = arith.addf %30, %29 : vector<8x128xf32>
    %32 = arith.divf %30, %31 : vector<8x128xf32>
    %33 = arith.mulf %24, %6 : vector<8x128xf32>
    %34 = arith.mulf %18, %26 : vector<8x128xf32>
    %35 = arith.addf %33, %34 : vector<8x128xf32>
    %36 = math.tanh %35 : vector<8x128xf32>
    %37 = arith.mulf %32, %36 : vector<8x128xf32>
    %38 = arith.addi %4, %c0_i32_6 : i32
    %39 = vector.broadcast %38 : i32 to vector<8x1xi32>
    %40 = arith.cmpi slt, %39, %3 : vector<8x1xi32>
    %41 = vector.shape_cast %40 : vector<8x1xi1> to vector<8x1xi1>
    %42 = vector.broadcast %41 : vector<8x1xi1> to vector<8x128xi1>
    %43 = arith.select %42, %37, %5 : vector<8x128xi1>, vector<8x128xf32>
    %44 = vector.shape_cast %40 : vector<8x1xi1> to vector<8x1xi1>
    %45 = vector.broadcast %44 : vector<8x1xi1> to vector<8x128xi1>
    %46 = arith.select %45, %35, %6 : vector<8x128xi1>, vector<8x128xf32>
    %cst_14 = arith.constant 0.000000e+00 : f32
    %47 = vector.shape_cast %40 : vector<8x1xi1> to vector<8x1xi1>
    %48 = vector.broadcast %47 : vector<8x1xi1> to vector<8x128xi1>
    %49 = vector.broadcast %cst_14 : f32 to vector<8x128xf32>
    %50 = arith.select %48, %37, %49 : vector<8x128xi1>, vector<8x128xf32>
    %51 = arith.index_cast %c0_i32_6 : i32 to index
    %c0_15 = arith.constant 0 : index
    %c0_16 = arith.constant 0 : index
    %52 = vector.load %arg5[%51, %c0_15, %c0_16] : memref<8x8x128xf32, #tpu.memory_space<vmem>>, vector<1x8x128xf32>
    %53 = vector.shape_cast %52 : vector<1x8x128xf32> to vector<8x128xf32>
    %54 = vector.shape_cast %50 : vector<8x128xf32> to vector<1x8x128xf32>
    tpu.vector_store %arg5[%51, %c0_15, %c0_16], %54 {strides = array<i32>} : memref<8x8x128xf32, #tpu.memory_space<vmem>>, vector<1x8x128xf32>,
    %c1_i32 = arith.constant 1 : i32
    %55 = arith.index_cast %c1_i32 : i32 to index
    %c0_17 = arith.constant 0 : index
    %c0_18 = arith.constant 0 : index
    %56 = vector.load %arg2[%55, %c0_17, %c0_18] : memref<8x8x512xf32, #tpu.memory_space<vmem>>, vector<1x8x512xf32>
    %57 = vector.shape_cast %56 : vector<1x8x512xf32> to vector<8x512xf32>
    %c0_19 = arith.constant 0 : index
    %c0_20 = arith.constant 0 : index
    %58 = vector.load %arg4[%c0_19, %c0_20] : memref<128x512xf32, #tpu.memory_space<vmem>>, vector<128x512xf32>
    %cst_21 = arith.constant dense<0.000000e+00> : vector<8x512xf32>
    %59 = tpu.matmul %43, %58, %cst_21 {dimension_numbers = #tpu.dot_dimension_numbers<[1], [0], [0], [1], [0, 0, 1, 1], [], []>} : vector<8x128xf32>, vector<128x512xf32>, vector<8x512xf32> -> vector<8x512xf32>
    %60 = arith.addf %57, %59 : vector<8x512xf32>
    %61 = vector.extract_strided_slice %60 {offsets = [0, 0], sizes = [8, 128], strides = [1, 1]} : vector<8x512xf32> to vector<8x128xf32>
    %62 = arith.negf %61 : vector<8x128xf32>
    %63 = math.exp %62 : vector<8x128xf32>
    %cst_22 = arith.constant 1.000000e+00 : f32
    %64 = vector.broadcast %cst_22 : f32 to vector<8x128xf32>
    %65 = arith.addf %64, %63 : vector<8x128xf32>
    %66 = arith.divf %64, %65 : vector<8x128xf32>
    %67 = vector.extract_strided_slice %60 {offsets = [0, 128], sizes = [8, 128], strides = [1, 1]} : vector<8x512xf32> to vector<8x128xf32>
    %68 = arith.negf %67 : vector<8x128xf32>
    %69 = math.exp %68 : vector<8x128xf32>
    %cst_23 = arith.constant 1.000000e+00 : f32
    %70 = vector.broadcast %cst_23 : f32 to vector<8x128xf32>
    %71 = arith.addf %70, %69 : vector<8x128xf32>
    %72 = arith.divf %70, %71 : vector<8x128xf32>
    %73 = vector.extract_strided_slice %60 {offsets = [0, 256], sizes = [8, 128], strides = [1, 1]} : vector<8x512xf32> to vector<8x128xf32>
    %74 = math.tanh %73 : vector<8x128xf32>
    %75 = vector.extract_strided_slice %60 {offsets = [0, 384], sizes = [8, 128], strides = [1, 1]} : vector<8x512xf32> to vector<8x128xf32>
    %76 = arith.negf %75 : vector<8x128xf32>
    %77 = math.exp %76 : vector<8x128xf32>
    %cst_24 = arith.constant 1.000000e+00 : f32
    %78 = vector.broadcast %cst_24 : f32 to vector<8x128xf32>
    %79 = arith.addf %78, %77 : vector<8x128xf32>
    %80 = arith.divf %78, %79 : vector<8x128xf32>
    %81 = arith.mulf %72, %46 : vector<8x128xf32>
    %82 = arith.mulf %66, %74 : vector<8x128xf32>
    %83 = arith.addf %81, %82 : vector<8x128xf32>
    %84 = math.tanh %83 : vector<8x128xf32>
    %85 = arith.mulf %80, %84 : vector<8x128xf32>
    %86 = arith.addi %4, %c1_i32 : i32
    %87 = vector.broadcast %86 : i32 to vector<8x1xi32>
    %88 = arith.cmpi slt, %87, %3 : vector<8x1xi32>
    %89 = vector.shape_cast %88 : vector<8x1xi1> to vector<8x1xi1>
    %90 = vector.broadcast %89 : vector<8x1xi1> to vector<8x128xi1>
    %91 = arith.select %90, %85, %43 : vector<8x128xi1>, vector<8x128xf32>
    %92 = vector.shape_cast %88 : vector<8x1xi1> to vector<8x1xi1>
    %93 = vector.broadcast %92 : vector<8x1xi1> to vector<8x128xi1>
    %94 = arith.select %93, %83, %46 : vector<8x128xi1>, vector<8x128xf32>
    %cst_25 = arith.constant 0.000000e+00 : f32
    %95 = vector.shape_cast %88 : vector<8x1xi1> to vector<8x1xi1>
    %96 = vector.broadcast %95 : vector<8x1xi1> to vector<8x128xi1>
    %97 = vector.broadcast %cst_25 : f32 to vector<8x128xf32>
    %98 = arith.select %96, %85, %97 : vector<8x128xi1>, vector<8x128xf32>
    %99 = arith.index_cast %c1_i32 : i32 to index
    %c0_26 = arith.constant 0 : index
    %c0_27 = arith.constant 0 : index
    %100 = vector.load %arg5[%99, %c0_26, %c0_27] : memref<8x8x128xf32, #tpu.memory_space<vmem>>, vector<1x8x128xf32>
    %101 = vector.shape_cast %100 : vector<1x8x128xf32> to vector<8x128xf32>
    %102 = vector.shape_cast %98 : vector<8x128xf32> to vector<1x8x128xf32>
    tpu.vector_store %arg5[%99, %c0_26, %c0_27], %102 {strides = array<i32>} : memref<8x8x128xf32, #tpu.memory_space<vmem>>, vector<1x8x128xf32>,
    %c2_i32 = arith.constant 2 : i32
    %103 = arith.index_cast %c2_i32 : i32 to index
    %c0_28 = arith.constant 0 : index
    %c0_29 = arith.constant 0 : index
    %104 = vector.load %arg2[%103, %c0_28, %c0_29] : memref<8x8x512xf32, #tpu.memory_space<vmem>>, vector<1x8x512xf32>
    %105 = vector.shape_cast %104 : vector<1x8x512xf32> to vector<8x512xf32>
    %c0_30 = arith.constant 0 : index
    %c0_31 = arith.constant 0 : index
    %106 = vector.load %arg4[%c0_30, %c0_31] : memref<128x512xf32, #tpu.memory_space<vmem>>, vector<128x512xf32>
    %cst_32 = arith.constant dense<0.000000e+00> : vector<8x512xf32>
    %107 = tpu.matmul %91, %106, %cst_32 {dimension_numbers = #tpu.dot_dimension_numbers<[1], [0], [0], [1], [0, 0, 1, 1], [], []>} : vector<8x128xf32>, vector<128x512xf32>, vector<8x512xf32> -> vector<8x512xf32>
    %108 = arith.addf %105, %107 : vector<8x512xf32>
    %109 = vector.extract_strided_slice %108 {offsets = [0, 0], sizes = [8, 128], strides = [1, 1]} : vector<8x512xf32> to vector<8x128xf32>
    %110 = arith.negf %109 : vector<8x128xf32>
    %111 = math.exp %110 : vector<8x128xf32>
    %cst_33 = arith.constant 1.000000e+00 : f32
    %112 = vector.broadcast %cst_33 : f32 to vector<8x128xf32>
    %113 = arith.addf %112, %111 : vector<8x128xf32>
    %114 = arith.divf %112, %113 : vector<8x128xf32>
    %115 = vector.extract_strided_slice %108 {offsets = [0, 128], sizes = [8, 128], strides = [1, 1]} : vector<8x512xf32> to vector<8x128xf32>
    %116 = arith.negf %115 : vector<8x128xf32>
    %117 = math.exp %116 : vector<8x128xf32>
    %cst_34 = arith.constant 1.000000e+00 : f32
    %118 = vector.broadcast %cst_34 : f32 to vector<8x128xf32>
    %119 = arith.addf %118, %117 : vector<8x128xf32>
    %120 = arith.divf %118, %119 : vector<8x128xf32>
    %121 = vector.extract_strided_slice %108 {offsets = [0, 256], sizes = [8, 128], strides = [1, 1]} : vector<8x512xf32> to vector<8x128xf32>
    %122 = math.tanh %121 : vector<8x128xf32>
    %123 = vector.extract_strided_slice %108 {offsets = [0, 384], sizes = [8, 128], strides = [1, 1]} : vector<8x512xf32> to vector<8x128xf32>
    %124 = arith.negf %123 : vector<8x128xf32>
    %125 = math.exp %124 : vector<8x128xf32>
    %cst_35 = arith.constant 1.000000e+00 : f32
    %126 = vector.broadcast %cst_35 : f32 to vector<8x128xf32>
    %127 = arith.addf %126, %125 : vector<8x128xf32>
    %128 = arith.divf %126, %127 : vector<8x128xf32>
    %129 = arith.mulf %120, %94 : vector<8x128xf32>
    %130 = arith.mulf %114, %122 : vector<8x128xf32>
    %131 = arith.addf %129, %130 : vector<8x128xf32>
    %132 = math.tanh %131 : vector<8x128xf32>
    %133 = arith.mulf %128, %132 : vector<8x128xf32>
    %134 = arith.addi %4, %c2_i32 : i32
    %135 = vector.broadcast %134 : i32 to vector<8x1xi32>
    %136 = arith.cmpi slt, %135, %3 : vector<8x1xi32>
    %137 = vector.shape_cast %136 : vector<8x1xi1> to vector<8x1xi1>
    %138 = vector.broadcast %137 : vector<8x1xi1> to vector<8x128xi1>
    %139 = arith.select %138, %133, %91 : vector<8x128xi1>, vector<8x128xf32>
    %140 = vector.shape_cast %136 : vector<8x1xi1> to vector<8x1xi1>
    %141 = vector.broadcast %140 : vector<8x1xi1> to vector<8x128xi1>
    %142 = arith.select %141, %131, %94 : vector<8x128xi1>, vector<8x128xf32>
    %cst_36 = arith.constant 0.000000e+00 : f32
    %143 = vector.shape_cast %136 : vector<8x1xi1> to vector<8x1xi1>
    %144 = vector.broadcast %143 : vector<8x1xi1> to vector<8x128xi1>
    %145 = vector.broadcast %cst_36 : f32 to vector<8x128xf32>
    %146 = arith.select %144, %133, %145 : vector<8x128xi1>, vector<8x128xf32>
    %147 = arith.index_cast %c2_i32 : i32 to index
    %c0_37 = arith.constant 0 : index
    %c0_38 = arith.constant 0 : index
    %148 = vector.load %arg5[%147, %c0_37, %c0_38] : memref<8x8x128xf32, #tpu.memory_space<vmem>>, vector<1x8x128xf32>
    %149 = vector.shape_cast %148 : vector<1x8x128xf32> to vector<8x128xf32>
    %150 = vector.shape_cast %146 : vector<8x128xf32> to vector<1x8x128xf32>
    tpu.vector_store %arg5[%147, %c0_37, %c0_38], %150 {strides = array<i32>} : memref<8x8x128xf32, #tpu.memory_space<vmem>>, vector<1x8x128xf32>,
    %c3_i32 = arith.constant 3 : i32
    %151 = arith.index_cast %c3_i32 : i32 to index
    %c0_39 = arith.constant 0 : index
    %c0_40 = arith.constant 0 : index
    %152 = vector.load %arg2[%151, %c0_39, %c0_40] : memref<8x8x512xf32, #tpu.memory_space<vmem>>, vector<1x8x512xf32>
    %153 = vector.shape_cast %152 : vector<1x8x512xf32> to vector<8x512xf32>
    %c0_41 = arith.constant 0 : index
    %c0_42 = arith.constant 0 : index
    %154 = vector.load %arg4[%c0_41, %c0_42] : memref<128x512xf32, #tpu.memory_space<vmem>>, vector<128x512xf32>
    %cst_43 = arith.constant dense<0.000000e+00> : vector<8x512xf32>
    %155 = tpu.matmul %139, %154, %cst_43 {dimension_numbers = #tpu.dot_dimension_numbers<[1], [0], [0], [1], [0, 0, 1, 1], [], []>} : vector<8x128xf32>, vector<128x512xf32>, vector<8x512xf32> -> vector<8x512xf32>
    %156 = arith.addf %153, %155 : vector<8x512xf32>
    %157 = vector.extract_strided_slice %156 {offsets = [0, 0], sizes = [8, 128], strides = [1, 1]} : vector<8x512xf32> to vector<8x128xf32>
    %158 = arith.negf %157 : vector<8x128xf32>
    %159 = math.exp %158 : vector<8x128xf32>
    %cst_44 = arith.constant 1.000000e+00 : f32
    %160 = vector.broadcast %cst_44 : f32 to vector<8x128xf32>
    %161 = arith.addf %160, %159 : vector<8x128xf32>
    %162 = arith.divf %160, %161 : vector<8x128xf32>
    %163 = vector.extract_strided_slice %156 {offsets = [0, 128], sizes = [8, 128], strides = [1, 1]} : vector<8x512xf32> to vector<8x128xf32>
    %164 = arith.negf %163 : vector<8x128xf32>
    %165 = math.exp %164 : vector<8x128xf32>
    %cst_45 = arith.constant 1.000000e+00 : f32
    %166 = vector.broadcast %cst_45 : f32 to vector<8x128xf32>
    %167 = arith.addf %166, %165 : vector<8x128xf32>
    %168 = arith.divf %166, %167 : vector<8x128xf32>
    %169 = vector.extract_strided_slice %156 {offsets = [0, 256], sizes = [8, 128], strides = [1, 1]} : vector<8x512xf32> to vector<8x128xf32>
    %170 = math.tanh %169 : vector<8x128xf32>
    %171 = vector.extract_strided_slice %156 {offsets = [0, 384], sizes = [8, 128], strides = [1, 1]} : vector<8x512xf32> to vector<8x128xf32>
    %172 = arith.negf %171 : vector<8x128xf32>
    %173 = math.exp %172 : vector<8x128xf32>
    %cst_46 = arith.constant 1.000000e+00 : f32
    %174 = vector.broadcast %cst_46 : f32 to vector<8x128xf32>
    %175 = arith.addf %174, %173 : vector<8x128xf32>
    %176 = arith.divf %174, %175 : vector<8x128xf32>
    %177 = arith.mulf %168, %142 : vector<8x128xf32>
    %178 = arith.mulf %162, %170 : vector<8x128xf32>
    %179 = arith.addf %177, %178 : vector<8x128xf32>
    %180 = math.tanh %179 : vector<8x128xf32>
    %181 = arith.mulf %176, %180 : vector<8x128xf32>
    %182 = arith.addi %4, %c3_i32 : i32
    %183 = vector.broadcast %182 : i32 to vector<8x1xi32>
    %184 = arith.cmpi slt, %183, %3 : vector<8x1xi32>
    %185 = vector.shape_cast %184 : vector<8x1xi1> to vector<8x1xi1>
    %186 = vector.broadcast %185 : vector<8x1xi1> to vector<8x128xi1>
    %187 = arith.select %186, %181, %139 : vector<8x128xi1>, vector<8x128xf32>
    %188 = vector.shape_cast %184 : vector<8x1xi1> to vector<8x1xi1>
    %189 = vector.broadcast %188 : vector<8x1xi1> to vector<8x128xi1>
    %190 = arith.select %189, %179, %142 : vector<8x128xi1>, vector<8x128xf32>
    %cst_47 = arith.constant 0.000000e+00 : f32
    %191 = vector.shape_cast %184 : vector<8x1xi1> to vector<8x1xi1>
    %192 = vector.broadcast %191 : vector<8x1xi1> to vector<8x128xi1>
    %193 = vector.broadcast %cst_47 : f32 to vector<8x128xf32>
    %194 = arith.select %192, %181, %193 : vector<8x128xi1>, vector<8x128xf32>
    %195 = arith.index_cast %c3_i32 : i32 to index
    %c0_48 = arith.constant 0 : index
    %c0_49 = arith.constant 0 : index
    %196 = vector.load %arg5[%195, %c0_48, %c0_49] : memref<8x8x128xf32, #tpu.memory_space<vmem>>, vector<1x8x128xf32>
    %197 = vector.shape_cast %196 : vector<1x8x128xf32> to vector<8x128xf32>
    %198 = vector.shape_cast %194 : vector<8x128xf32> to vector<1x8x128xf32>
    tpu.vector_store %arg5[%195, %c0_48, %c0_49], %198 {strides = array<i32>} : memref<8x8x128xf32, #tpu.memory_space<vmem>>, vector<1x8x128xf32>,
    %c4_i32 = arith.constant 4 : i32
    %199 = arith.index_cast %c4_i32 : i32 to index
    %c0_50 = arith.constant 0 : index
    %c0_51 = arith.constant 0 : index
    %200 = vector.load %arg2[%199, %c0_50, %c0_51] : memref<8x8x512xf32, #tpu.memory_space<vmem>>, vector<1x8x512xf32>
    %201 = vector.shape_cast %200 : vector<1x8x512xf32> to vector<8x512xf32>
    %c0_52 = arith.constant 0 : index
    %c0_53 = arith.constant 0 : index
    %202 = vector.load %arg4[%c0_52, %c0_53] : memref<128x512xf32, #tpu.memory_space<vmem>>, vector<128x512xf32>
    %cst_54 = arith.constant dense<0.000000e+00> : vector<8x512xf32>
    %203 = tpu.matmul %187, %202, %cst_54 {dimension_numbers = #tpu.dot_dimension_numbers<[1], [0], [0], [1], [0, 0, 1, 1], [], []>} : vector<8x128xf32>, vector<128x512xf32>, vector<8x512xf32> -> vector<8x512xf32>
    %204 = arith.addf %201, %203 : vector<8x512xf32>
    %205 = vector.extract_strided_slice %204 {offsets = [0, 0], sizes = [8, 128], strides = [1, 1]} : vector<8x512xf32> to vector<8x128xf32>
    %206 = arith.negf %205 : vector<8x128xf32>
    %207 = math.exp %206 : vector<8x128xf32>
    %cst_55 = arith.constant 1.000000e+00 : f32
    %208 = vector.broadcast %cst_55 : f32 to vector<8x128xf32>
    %209 = arith.addf %208, %207 : vector<8x128xf32>
    %210 = arith.divf %208, %209 : vector<8x128xf32>
    %211 = vector.extract_strided_slice %204 {offsets = [0, 128], sizes = [8, 128], strides = [1, 1]} : vector<8x512xf32> to vector<8x128xf32>
    %212 = arith.negf %211 : vector<8x128xf32>
    %213 = math.exp %212 : vector<8x128xf32>
    %cst_56 = arith.constant 1.000000e+00 : f32
    %214 = vector.broadcast %cst_56 : f32 to vector<8x128xf32>
    %215 = arith.addf %214, %213 : vector<8x128xf32>
    %216 = arith.divf %214, %215 : vector<8x128xf32>
    %217 = vector.extract_strided_slice %204 {offsets = [0, 256], sizes = [8, 128], strides = [1, 1]} : vector<8x512xf32> to vector<8x128xf32>
    %218 = math.tanh %217 : vector<8x128xf32>
    %219 = vector.extract_strided_slice %204 {offsets = [0, 384], sizes = [8, 128], strides = [1, 1]} : vector<8x512xf32> to vector<8x128xf32>
    %220 = arith.negf %219 : vector<8x128xf32>
    %221 = math.exp %220 : vector<8x128xf32>
    %cst_57 = arith.constant 1.000000e+00 : f32
    %222 = vector.broadcast %cst_57 : f32 to vector<8x128xf32>
    %223 = arith.addf %222, %221 : vector<8x128xf32>
    %224 = arith.divf %222, %223 : vector<8x128xf32>
    %225 = arith.mulf %216, %190 : vector<8x128xf32>
    %226 = arith.mulf %210, %218 : vector<8x128xf32>
    %227 = arith.addf %225, %226 : vector<8x128xf32>
    %228 = math.tanh %227 : vector<8x128xf32>
    %229 = arith.mulf %224, %228 : vector<8x128xf32>
    %230 = arith.addi %4, %c4_i32 : i32
    %231 = vector.broadcast %230 : i32 to vector<8x1xi32>
    %232 = arith.cmpi slt, %231, %3 : vector<8x1xi32>
    %233 = vector.shape_cast %232 : vector<8x1xi1> to vector<8x1xi1>
    %234 = vector.broadcast %233 : vector<8x1xi1> to vector<8x128xi1>
    %235 = arith.select %234, %229, %187 : vector<8x128xi1>, vector<8x128xf32>
    %236 = vector.shape_cast %232 : vector<8x1xi1> to vector<8x1xi1>
    %237 = vector.broadcast %236 : vector<8x1xi1> to vector<8x128xi1>
    %238 = arith.select %237, %227, %190 : vector<8x128xi1>, vector<8x128xf32>
    %cst_58 = arith.constant 0.000000e+00 : f32
    %239 = vector.shape_cast %232 : vector<8x1xi1> to vector<8x1xi1>
    %240 = vector.broadcast %239 : vector<8x1xi1> to vector<8x128xi1>
    %241 = vector.broadcast %cst_58 : f32 to vector<8x128xf32>
    %242 = arith.select %240, %229, %241 : vector<8x128xi1>, vector<8x128xf32>
    %243 = arith.index_cast %c4_i32 : i32 to index
    %c0_59 = arith.constant 0 : index
    %c0_60 = arith.constant 0 : index
    %244 = vector.load %arg5[%243, %c0_59, %c0_60] : memref<8x8x128xf32, #tpu.memory_space<vmem>>, vector<1x8x128xf32>
    %245 = vector.shape_cast %244 : vector<1x8x128xf32> to vector<8x128xf32>
    %246 = vector.shape_cast %242 : vector<8x128xf32> to vector<1x8x128xf32>
    tpu.vector_store %arg5[%243, %c0_59, %c0_60], %246 {strides = array<i32>} : memref<8x8x128xf32, #tpu.memory_space<vmem>>, vector<1x8x128xf32>,
    %c5_i32 = arith.constant 5 : i32
    %247 = arith.index_cast %c5_i32 : i32 to index
    %c0_61 = arith.constant 0 : index
    %c0_62 = arith.constant 0 : index
    %248 = vector.load %arg2[%247, %c0_61, %c0_62] : memref<8x8x512xf32, #tpu.memory_space<vmem>>, vector<1x8x512xf32>
    %249 = vector.shape_cast %248 : vector<1x8x512xf32> to vector<8x512xf32>
    %c0_63 = arith.constant 0 : index
    %c0_64 = arith.constant 0 : index
    %250 = vector.load %arg4[%c0_63, %c0_64] : memref<128x512xf32, #tpu.memory_space<vmem>>, vector<128x512xf32>
    %cst_65 = arith.constant dense<0.000000e+00> : vector<8x512xf32>
    %251 = tpu.matmul %235, %250, %cst_65 {dimension_numbers = #tpu.dot_dimension_numbers<[1], [0], [0], [1], [0, 0, 1, 1], [], []>} : vector<8x128xf32>, vector<128x512xf32>, vector<8x512xf32> -> vector<8x512xf32>
    %252 = arith.addf %249, %251 : vector<8x512xf32>
    %253 = vector.extract_strided_slice %252 {offsets = [0, 0], sizes = [8, 128], strides = [1, 1]} : vector<8x512xf32> to vector<8x128xf32>
    %254 = arith.negf %253 : vector<8x128xf32>
    %255 = math.exp %254 : vector<8x128xf32>
    %cst_66 = arith.constant 1.000000e+00 : f32
    %256 = vector.broadcast %cst_66 : f32 to vector<8x128xf32>
    %257 = arith.addf %256, %255 : vector<8x128xf32>
    %258 = arith.divf %256, %257 : vector<8x128xf32>
    %259 = vector.extract_strided_slice %252 {offsets = [0, 128], sizes = [8, 128], strides = [1, 1]} : vector<8x512xf32> to vector<8x128xf32>
    %260 = arith.negf %259 : vector<8x128xf32>
    %261 = math.exp %260 : vector<8x128xf32>
    %cst_67 = arith.constant 1.000000e+00 : f32
    %262 = vector.broadcast %cst_67 : f32 to vector<8x128xf32>
    %263 = arith.addf %262, %261 : vector<8x128xf32>
    %264 = arith.divf %262, %263 : vector<8x128xf32>
    %265 = vector.extract_strided_slice %252 {offsets = [0, 256], sizes = [8, 128], strides = [1, 1]} : vector<8x512xf32> to vector<8x128xf32>
    %266 = math.tanh %265 : vector<8x128xf32>
    %267 = vector.extract_strided_slice %252 {offsets = [0, 384], sizes = [8, 128], strides = [1, 1]} : vector<8x512xf32> to vector<8x128xf32>
    %268 = arith.negf %267 : vector<8x128xf32>
    %269 = math.exp %268 : vector<8x128xf32>
    %cst_68 = arith.constant 1.000000e+00 : f32
    %270 = vector.broadcast %cst_68 : f32 to vector<8x128xf32>
    %271 = arith.addf %270, %269 : vector<8x128xf32>
    %272 = arith.divf %270, %271 : vector<8x128xf32>
    %273 = arith.mulf %264, %238 : vector<8x128xf32>
    %274 = arith.mulf %258, %266 : vector<8x128xf32>
    %275 = arith.addf %273, %274 : vector<8x128xf32>
    %276 = math.tanh %275 : vector<8x128xf32>
    %277 = arith.mulf %272, %276 : vector<8x128xf32>
    %278 = arith.addi %4, %c5_i32 : i32
    %279 = vector.broadcast %278 : i32 to vector<8x1xi32>
    %280 = arith.cmpi slt, %279, %3 : vector<8x1xi32>
    %281 = vector.shape_cast %280 : vector<8x1xi1> to vector<8x1xi1>
    %282 = vector.broadcast %281 : vector<8x1xi1> to vector<8x128xi1>
    %283 = arith.select %282, %277, %235 : vector<8x128xi1>, vector<8x128xf32>
    %284 = vector.shape_cast %280 : vector<8x1xi1> to vector<8x1xi1>
    %285 = vector.broadcast %284 : vector<8x1xi1> to vector<8x128xi1>
    %286 = arith.select %285, %275, %238 : vector<8x128xi1>, vector<8x128xf32>
    %cst_69 = arith.constant 0.000000e+00 : f32
    %287 = vector.shape_cast %280 : vector<8x1xi1> to vector<8x1xi1>
    %288 = vector.broadcast %287 : vector<8x1xi1> to vector<8x128xi1>
    %289 = vector.broadcast %cst_69 : f32 to vector<8x128xf32>
    %290 = arith.select %288, %277, %289 : vector<8x128xi1>, vector<8x128xf32>
    %291 = arith.index_cast %c5_i32 : i32 to index
    %c0_70 = arith.constant 0 : index
    %c0_71 = arith.constant 0 : index
    %292 = vector.load %arg5[%291, %c0_70, %c0_71] : memref<8x8x128xf32, #tpu.memory_space<vmem>>, vector<1x8x128xf32>
    %293 = vector.shape_cast %292 : vector<1x8x128xf32> to vector<8x128xf32>
    %294 = vector.shape_cast %290 : vector<8x128xf32> to vector<1x8x128xf32>
    tpu.vector_store %arg5[%291, %c0_70, %c0_71], %294 {strides = array<i32>} : memref<8x8x128xf32, #tpu.memory_space<vmem>>, vector<1x8x128xf32>,
    %c6_i32 = arith.constant 6 : i32
    %295 = arith.index_cast %c6_i32 : i32 to index
    %c0_72 = arith.constant 0 : index
    %c0_73 = arith.constant 0 : index
    %296 = vector.load %arg2[%295, %c0_72, %c0_73] : memref<8x8x512xf32, #tpu.memory_space<vmem>>, vector<1x8x512xf32>
    %297 = vector.shape_cast %296 : vector<1x8x512xf32> to vector<8x512xf32>
    %c0_74 = arith.constant 0 : index
    %c0_75 = arith.constant 0 : index
    %298 = vector.load %arg4[%c0_74, %c0_75] : memref<128x512xf32, #tpu.memory_space<vmem>>, vector<128x512xf32>
    %cst_76 = arith.constant dense<0.000000e+00> : vector<8x512xf32>
    %299 = tpu.matmul %283, %298, %cst_76 {dimension_numbers = #tpu.dot_dimension_numbers<[1], [0], [0], [1], [0, 0, 1, 1], [], []>} : vector<8x128xf32>, vector<128x512xf32>, vector<8x512xf32> -> vector<8x512xf32>
    %300 = arith.addf %297, %299 : vector<8x512xf32>
    %301 = vector.extract_strided_slice %300 {offsets = [0, 0], sizes = [8, 128], strides = [1, 1]} : vector<8x512xf32> to vector<8x128xf32>
    %302 = arith.negf %301 : vector<8x128xf32>
    %303 = math.exp %302 : vector<8x128xf32>
    %cst_77 = arith.constant 1.000000e+00 : f32
    %304 = vector.broadcast %cst_77 : f32 to vector<8x128xf32>
    %305 = arith.addf %304, %303 : vector<8x128xf32>
    %306 = arith.divf %304, %305 : vector<8x128xf32>
    %307 = vector.extract_strided_slice %300 {offsets = [0, 128], sizes = [8, 128], strides = [1, 1]} : vector<8x512xf32> to vector<8x128xf32>
    %308 = arith.negf %307 : vector<8x128xf32>
    %309 = math.exp %308 : vector<8x128xf32>
    %cst_78 = arith.constant 1.000000e+00 : f32
    %310 = vector.broadcast %cst_78 : f32 to vector<8x128xf32>
    %311 = arith.addf %310, %309 : vector<8x128xf32>
    %312 = arith.divf %310, %311 : vector<8x128xf32>
    %313 = vector.extract_strided_slice %300 {offsets = [0, 256], sizes = [8, 128], strides = [1, 1]} : vector<8x512xf32> to vector<8x128xf32>
    %314 = math.tanh %313 : vector<8x128xf32>
    %315 = vector.extract_strided_slice %300 {offsets = [0, 384], sizes = [8, 128], strides = [1, 1]} : vector<8x512xf32> to vector<8x128xf32>
    %316 = arith.negf %315 : vector<8x128xf32>
    %317 = math.exp %316 : vector<8x128xf32>
    %cst_79 = arith.constant 1.000000e+00 : f32
    %318 = vector.broadcast %cst_79 : f32 to vector<8x128xf32>
    %319 = arith.addf %318, %317 : vector<8x128xf32>
    %320 = arith.divf %318, %319 : vector<8x128xf32>
    %321 = arith.mulf %312, %286 : vector<8x128xf32>
    %322 = arith.mulf %306, %314 : vector<8x128xf32>
    %323 = arith.addf %321, %322 : vector<8x128xf32>
    %324 = math.tanh %323 : vector<8x128xf32>
    %325 = arith.mulf %320, %324 : vector<8x128xf32>
    %326 = arith.addi %4, %c6_i32 : i32
    %327 = vector.broadcast %326 : i32 to vector<8x1xi32>
    %328 = arith.cmpi slt, %327, %3 : vector<8x1xi32>
    %329 = vector.shape_cast %328 : vector<8x1xi1> to vector<8x1xi1>
    %330 = vector.broadcast %329 : vector<8x1xi1> to vector<8x128xi1>
    %331 = arith.select %330, %325, %283 : vector<8x128xi1>, vector<8x128xf32>
    %332 = vector.shape_cast %328 : vector<8x1xi1> to vector<8x1xi1>
    %333 = vector.broadcast %332 : vector<8x1xi1> to vector<8x128xi1>
    %334 = arith.select %333, %323, %286 : vector<8x128xi1>, vector<8x128xf32>
    %cst_80 = arith.constant 0.000000e+00 : f32
    %335 = vector.shape_cast %328 : vector<8x1xi1> to vector<8x1xi1>
    %336 = vector.broadcast %335 : vector<8x1xi1> to vector<8x128xi1>
    %337 = vector.broadcast %cst_80 : f32 to vector<8x128xf32>
    %338 = arith.select %336, %325, %337 : vector<8x128xi1>, vector<8x128xf32>
    %339 = arith.index_cast %c6_i32 : i32 to index
    %c0_81 = arith.constant 0 : index
    %c0_82 = arith.constant 0 : index
    %340 = vector.load %arg5[%339, %c0_81, %c0_82] : memref<8x8x128xf32, #tpu.memory_space<vmem>>, vector<1x8x128xf32>
    %341 = vector.shape_cast %340 : vector<1x8x128xf32> to vector<8x128xf32>
    %342 = vector.shape_cast %338 : vector<8x128xf32> to vector<1x8x128xf32>
    tpu.vector_store %arg5[%339, %c0_81, %c0_82], %342 {strides = array<i32>} : memref<8x8x128xf32, #tpu.memory_space<vmem>>, vector<1x8x128xf32>,
    %c7_i32 = arith.constant 7 : i32
    %343 = arith.index_cast %c7_i32 : i32 to index
    %c0_83 = arith.constant 0 : index
    %c0_84 = arith.constant 0 : index
    %344 = vector.load %arg2[%343, %c0_83, %c0_84] : memref<8x8x512xf32, #tpu.memory_space<vmem>>, vector<1x8x512xf32>
    %345 = vector.shape_cast %344 : vector<1x8x512xf32> to vector<8x512xf32>
    %c0_85 = arith.constant 0 : index
    %c0_86 = arith.constant 0 : index
    %346 = vector.load %arg4[%c0_85, %c0_86] : memref<128x512xf32, #tpu.memory_space<vmem>>, vector<128x512xf32>
    %cst_87 = arith.constant dense<0.000000e+00> : vector<8x512xf32>
    %347 = tpu.matmul %331, %346, %cst_87 {dimension_numbers = #tpu.dot_dimension_numbers<[1], [0], [0], [1], [0, 0, 1, 1], [], []>} : vector<8x128xf32>, vector<128x512xf32>, vector<8x512xf32> -> vector<8x512xf32>
    %348 = arith.addf %345, %347 : vector<8x512xf32>
    %349 = vector.extract_strided_slice %348 {offsets = [0, 0], sizes = [8, 128], strides = [1, 1]} : vector<8x512xf32> to vector<8x128xf32>
    %350 = arith.negf %349 : vector<8x128xf32>
    %351 = math.exp %350 : vector<8x128xf32>
    %cst_88 = arith.constant 1.000000e+00 : f32
    %352 = vector.broadcast %cst_88 : f32 to vector<8x128xf32>
    %353 = arith.addf %352, %351 : vector<8x128xf32>
    %354 = arith.divf %352, %353 : vector<8x128xf32>
    %355 = vector.extract_strided_slice %348 {offsets = [0, 128], sizes = [8, 128], strides = [1, 1]} : vector<8x512xf32> to vector<8x128xf32>
    %356 = arith.negf %355 : vector<8x128xf32>
    %357 = math.exp %356 : vector<8x128xf32>
    %cst_89 = arith.constant 1.000000e+00 : f32
    %358 = vector.broadcast %cst_89 : f32 to vector<8x128xf32>
    %359 = arith.addf %358, %357 : vector<8x128xf32>
    %360 = arith.divf %358, %359 : vector<8x128xf32>
    %361 = vector.extract_strided_slice %348 {offsets = [0, 256], sizes = [8, 128], strides = [1, 1]} : vector<8x512xf32> to vector<8x128xf32>
    %362 = math.tanh %361 : vector<8x128xf32>
    %363 = vector.extract_strided_slice %348 {offsets = [0, 384], sizes = [8, 128], strides = [1, 1]} : vector<8x512xf32> to vector<8x128xf32>
    %364 = arith.negf %363 : vector<8x128xf32>
    %365 = math.exp %364 : vector<8x128xf32>
    %cst_90 = arith.constant 1.000000e+00 : f32
    %366 = vector.broadcast %cst_90 : f32 to vector<8x128xf32>
    %367 = arith.addf %366, %365 : vector<8x128xf32>
    %368 = arith.divf %366, %367 : vector<8x128xf32>
    %369 = arith.mulf %360, %334 : vector<8x128xf32>
    %370 = arith.mulf %354, %362 : vector<8x128xf32>
    %371 = arith.addf %369, %370 : vector<8x128xf32>
    %372 = math.tanh %371 : vector<8x128xf32>
    %373 = arith.mulf %368, %372 : vector<8x128xf32>
    %374 = arith.addi %4, %c7_i32 : i32
    %375 = vector.broadcast %374 : i32 to vector<8x1xi32>
    %376 = arith.cmpi slt, %375, %3 : vector<8x1xi32>
    %377 = vector.shape_cast %376 : vector<8x1xi1> to vector<8x1xi1>
    %378 = vector.broadcast %377 : vector<8x1xi1> to vector<8x128xi1>
    %379 = arith.select %378, %373, %331 : vector<8x128xi1>, vector<8x128xf32>
    %380 = vector.shape_cast %376 : vector<8x1xi1> to vector<8x1xi1>
    %381 = vector.broadcast %380 : vector<8x1xi1> to vector<8x128xi1>
    %382 = arith.select %381, %371, %334 : vector<8x128xi1>, vector<8x128xf32>
    %cst_91 = arith.constant 0.000000e+00 : f32
    %383 = vector.shape_cast %376 : vector<8x1xi1> to vector<8x1xi1>
    %384 = vector.broadcast %383 : vector<8x1xi1> to vector<8x128xi1>
    %385 = vector.broadcast %cst_91 : f32 to vector<8x128xf32>
    %386 = arith.select %384, %373, %385 : vector<8x128xi1>, vector<8x128xf32>
    %387 = arith.index_cast %c7_i32 : i32 to index
    %c0_92 = arith.constant 0 : index
    %c0_93 = arith.constant 0 : index
    %388 = vector.load %arg5[%387, %c0_92, %c0_93] : memref<8x8x128xf32, #tpu.memory_space<vmem>>, vector<1x8x128xf32>
    %389 = vector.shape_cast %388 : vector<1x8x128xf32> to vector<8x128xf32>
    %390 = vector.shape_cast %386 : vector<8x128xf32> to vector<1x8x128xf32>
    tpu.vector_store %arg5[%387, %c0_92, %c0_93], %390 {strides = array<i32>} : memref<8x8x128xf32, #tpu.memory_space<vmem>>, vector<1x8x128xf32>,
    %c8_i32_94 = arith.constant 8 : i32
    %c0_95 = arith.constant 0 : index
    %c0_96 = arith.constant 0 : index
    %391 = vector.load %arg8[%c0_95, %c0_96] : memref<8x128xf32, #tpu.memory_space<vmem>>, vector<8x128xf32>
    tpu.vector_store %arg8[%c0_95, %c0_96], %379 {strides = array<i32>} : memref<8x128xf32, #tpu.memory_space<vmem>>, vector<8x128xf32>,
    %c0_97 = arith.constant 0 : index
    %c0_98 = arith.constant 0 : index
    %392 = vector.load %arg9[%c0_97, %c0_98] : memref<8x128xf32, #tpu.memory_space<vmem>>, vector<8x128xf32>
    tpu.vector_store %arg9[%c0_97, %c0_98], %382 {strides = array<i32>} : memref<8x128xf32, #tpu.memory_space<vmem>>, vector<8x128xf32>,
    %c0_99 = arith.constant 0 : index
    %c0_100 = arith.constant 0 : index
    %393 = vector.load %arg6[%c0_99, %c0_100] : memref<8x128xf32, #tpu.memory_space<vmem>>, vector<8x128xf32>
    tpu.vector_store %arg6[%c0_99, %c0_100], %379 {strides = array<i32>} : memref<8x128xf32, #tpu.memory_space<vmem>>, vector<8x128xf32>,
    %c0_101 = arith.constant 0 : index
    %c0_102 = arith.constant 0 : index
    %394 = vector.load %arg7[%c0_101, %c0_102] : memref<8x128xf32, #tpu.memory_space<vmem>>, vector<8x128xf32>
    tpu.vector_store %arg7[%c0_101, %c0_102], %382 {strides = array<i32>} : memref<8x128xf32, #tpu.memory_space<vmem>>, vector<8x128xf32>,
    return
  }
  func.func @transform_0(%arg0: i32, %arg1: i32) -> (i32, i32, i32) {
    %c0_i32 = arith.constant 0 : i32
    %c0_i32_0 = arith.constant 0 : i32
    return %arg1, %arg0, %c0_i32 : i32, i32, i32
  }
  func.func @transform_1(%arg0: i32, %arg1: i32) -> (i32, i32) {
    %c0_i32 = arith.constant 0 : i32
    %c0_i32_0 = arith.constant 0 : i32
    return %arg0, %c0_i32 : i32, i32
  }
  func.func @transform_2(%arg0: i32, %arg1: i32) -> (i32, i32) {
    %c0_i32 = arith.constant 0 : i32
    %c0_i32_0 = arith.constant 0 : i32
    %c0_i32_1 = arith.constant 0 : i32
    return %c0_i32, %c0_i32_0 : i32, i32
  }
  func.func @transform_3(%arg0: i32, %arg1: i32) -> (i32, i32, i32) {
    %c0_i32 = arith.constant 0 : i32
    %c0_i32_0 = arith.constant 0 : i32
    return %arg1, %arg0, %c0_i32 : i32, i32, i32
  }
  func.func @transform_4(%arg0: i32, %arg1: i32) -> (i32, i32) {
    %c0_i32 = arith.constant 0 : i32
    %c0_i32_0 = arith.constant 0 : i32
    return %arg0, %c0_i32 : i32, i32
  }
  func.func @transform_5(%arg0: i32, %arg1: i32) -> (i32, i32) {
    %c0_i32 = arith.constant 0 : i32
    %c0_i32_0 = arith.constant 0 : i32
    return %arg0, %c0_i32 : i32, i32
  }
}

</mosaic_0001>

<bundles_post_ra>
// kernel: tpu_custom_call.1
= control target key start
LH: loop header
LB: loop body
LE: loop exit
PB: predicated region body
PF: predicated region fallthrough
CT: control target
= control target key end

     0   :  { %11 = vsyncpa [#allocation5], 0  ;;  %s3393_s0 = inlined_call_operand.hbm [shape: f32[8,8,512], index: 0, kind: input, shape index: {}]   ;;  %s3394_s1 = inlined_call_operand.vmem [shape: s32[8,1], index: 1, kind: input, shape index: {}]   ;;  %s3395_s2 = inlined_call_operand.hbm [shape: f32[128,512], index: 2, kind: input, shape index: {}]   ;;  %s3396_s3 = inlined_call_operand.hbm [shape: f32[8,8,128], index: 3, kind: output, shape index: {0}]   ;;  %s3397_s4 = inlined_call_operand.hbm [shape: f32[8,128], index: 4, kind: output, shape index: {1}]   ;;  %s3398_s5 = inlined_call_operand.hbm [shape: f32[8,128], index: 5, kind: output, shape index: {2}]  }
   0x1   :  { %12 = vsyncpa [#allocation8], 0 }
   0x2   :  { %13 = vsyncpa [#allocation6], 0 }
   0x3   :  { %14 = vsyncpa [#allocation11], 0  ;;  %s19_s20 = sshll.u32 %s3393_s0, 4  ;;  %s2252_s21 = smov [#allocation4]   ;;  %s20_s20 = int_to_ptr.hbm [resolvable:$true] %s19_s20 }
   0x4   :  { %s21_s22 = sshll.u32 %s2252_s21, 4  ;;  %s34_s25 = sshll.u32 %s3395_s2, 4  ;;  %s22_s22 = int_to_ptr.vmem [resolvable:$true] %s21_s22  ;;  %s35_s25 = int_to_ptr.hbm [resolvable:$true] %s34_s25 }
   0x5   :  { %s2253_s26 = smov 512   ;;  %s2254_s27 = smov 32  }
   0x6   :  { %27 = dma.hbm_to_vmem [thread:$0]  %s20_s20, 4096, %s22_s22, [#allocation5], %s2253_s26, %s2253_s26, %s2254_s27  }
   0x7   :  { %s2255_s28 = smov [#allocation7]  }
   0x8   :  { %s36_s29 = sshll.u32 %s2255_s28, 4  ;;  %s37_s29 = int_to_ptr.vmem [resolvable:$true] %s36_s29 }
   0x9   :  { %42 = dma.hbm_to_vmem [thread:$0]  %s35_s25, 8192, %s37_s29, [#allocation8], %s2253_s26, %s2253_s26, %s2254_s27  }
   0xa   :  { %2244 = dma.done.wait [#allocation5], 4096  }
   0xb   :  { %2245 = vsyncadd [#allocation5], 4294963200 }
   0xc   :  { %2246 = dma.done.wait [#allocation8], 8192  }
   0xd   :  { %2247 = vsyncadd [#allocation8], 4294959104  ;;  %v2299_v0 = vld [vmem:[#allocation7 + $0x1e0] sm:$0xff]  ;;  %v2301_v1 = vld [vmem:[#allocation7 + $0x1e8] sm:$0xff]  ;;  %v2256_v61 = vmov 0.0   ;;  %v3405_v62 = vmov 0  }
   0xe   :  { %3450 = vst [vmem:[#allocation17_spill] sm:$0xff] %v2301_v1  ;;  %v2303_v2 = vld [vmem:[#allocation7 + $0x1f8] sm:$0xff]  ;;  %129 = vmatpush.msra.mxu0 %v2299_v0  ;;  %149 = vmatpush.msra.mxu1 %v2301_v1  ;;  %v2307_v3 = vld [vmem:[#allocation7 + $0x1c0] sm:$0xff]  ;;  %v2309_v4 = vld [vmem:[#allocation7 + $0x1c8] sm:$0xff]  ;;  %s1900_s10 = sshll.u32 %s3396_s3, 4  ;;  %s2259_s11 = smov [#allocation10]   ;;  %s1901_s10 = int_to_ptr.hbm [resolvable:$true] %s1900_s10 }
   0xf   :  { %v2311_v5 = vld [vmem:[#allocation7 + $0x1d8] sm:$0xff]  ;;  %189 = vmatpush.msra.mxu3 %v2303_v2  ;;  %v2314_v6 = vld [vmem:[#allocation7 + $0x1a0] sm:$0xff]  ;;  %v2316_v7 = vld [vmem:[#allocation7 + $0x1a8] sm:$0xff]  ;;  %1992 = vset.pattern.permute.xlu0 %v3405_v62  ;;  %s1912_s12 = sshll.u32 %s2259_s11, 4  ;;  %s1914_s15 = sshll.u32 %s3397_s4, 4  ;;  %s1913_s12 = int_to_ptr.vmem [resolvable:$true] %s1912_s12  ;;  %s1915_s15 = int_to_ptr.hbm [resolvable:$true] %s1914_s15 }
  0x10   :  { %130 = vmatpush.msra.mxu0 %v2307_v3  ;;  %150 = vmatpush.msra.mxu1 %v2309_v4  ;;  %v2320_v8 = vld [vmem:[#allocation7 + $0x1b8] sm:$0xff]  ;;  %v2323_v9 = vld [vmem:[#allocation7 + $0x180] sm:$0xff]  ;;  %v2325_v10 = vld [vmem:[#allocation7 + $0x188] sm:$0xff]  ;;  %s2260_s16 = smov [#allocation12]   ;;  %s1925_s20 = sshll.u32 %s3398_s5, 4  ;;  %s1926_s20 = int_to_ptr.hbm [resolvable:$true] %s1925_s20 }
  0x11   :  { %190 = vmatpush.msra.mxu3 %v2311_v5  ;;  %v2329_v11 = vld [vmem:[#allocation7 + $0x198] sm:$0xff]  ;;  %v2332_v12 = vld [vmem:[#allocation7 + $0x160] sm:$0xff]  ;;  %v2334_v13 = vld [vmem:[#allocation7 + $0x168] sm:$0xff]  ;;  %s1923_s17 = sshll.u32 %s2260_s16, 4  ;;  %s2261_s3 = smov 128   ;;  %s1924_s17 = int_to_ptr.vmem [resolvable:$true] %s1923_s17 }
  0x12   :  { %131 = vmatpush.msra.mxu0 %v2314_v6  ;;  %151 = vmatpush.msra.mxu1 %v2316_v7  ;;  %v2338_v14 = vld [vmem:[#allocation7 + $0x178] sm:$0xff]  ;;  %v2341_v15 = vld [vmem:[#allocation7 + $0x140] sm:$0xff]  ;;  %v2343_v16 = vld [vmem:[#allocation7 + $0x148] sm:$0xff]  ;;  %s2262_s4 = smov 8  }
  0x13   :  { %191 = vmatpush.msra.mxu3 %v2320_v8  ;;  %v2345_v17 = vld [vmem:[#allocation7 + $0x1f0] sm:$0xff]  ;;  %v2349_v18 = vld [vmem:[#allocation7 + $0x158] sm:$0xff]  ;;  %v2354_v20 = vld [vmem:[#allocation7 + $0x120] sm:$0xff] }
  0x14   :  { %132 = vmatpush.msra.mxu0 %v2323_v9  ;;  %152 = vmatpush.msra.mxu1 %v2325_v10  ;;  %v2351_v19 = vld [vmem:[#allocation7 + $0x1d0] sm:$0xff]  ;;  %v2356_v21 = vld [vmem:[#allocation7 + $0x128] sm:$0xff]  ;;  %v2361_v22 = vld [vmem:[#allocation7 + $0x138] sm:$0xff] }
  0x15   :  { %192 = vmatpush.msra.mxu3 %v2329_v11  ;;  %169 = vmatpush.msra.mxu2 %v2345_v17  ;;  %v2363_v23 = vld [vmem:[#allocation7 + $0x1b0] sm:$0xff]  ;;  %v2366_v24 = vld [vmem:[#allocation7 + $0x100] sm:$0xff]  ;;  %v2368_v25 = vld [vmem:[#allocation7 + $0x108] sm:$0xff] }
  0x16   :  { %133 = vmatpush.msra.mxu0 %v2332_v12  ;;  %153 = vmatpush.msra.mxu1 %v2334_v13  ;;  %v2373_v26 = vld [vmem:[#allocation7 + $0x118] sm:$0xff]  ;;  %v2375_v27 = vld [vmem:[#allocation7 + $0x190] sm:$0xff]  ;;  %v2378_v28 = vld [vmem:[#allocation7 + $0xe0] sm:$0xff] }
  0x17   :  { %193 = vmatpush.msra.mxu3 %v2338_v14  ;;  %170 = vmatpush.msra.mxu2 %v2351_v19  ;;  %v2380_v29 = vld [vmem:[#allocation7 + $0xe8] sm:$0xff]  ;;  %v2385_v30 = vld [vmem:[#allocation7 + $0xf8] sm:$0xff]  ;;  %v2387_v31 = vld [vmem:[#allocation7 + $0x170] sm:$0xff] }
  0x18   :  { %134 = vmatpush.msra.mxu0 %v2341_v15  ;;  %154 = vmatpush.msra.mxu1 %v2343_v16  ;;  %v2390_v32 = vld [vmem:[#allocation7 + $0xc0] sm:$0xff]  ;;  %v2392_v33 = vld [vmem:[#allocation7 + $0xc8] sm:$0xff]  ;;  %v2397_v34 = vld [vmem:[#allocation7 + $0xd8] sm:$0xff] }
  0x19   :  { %194 = vmatpush.msra.mxu3 %v2349_v18  ;;  %171 = vmatpush.msra.mxu2 %v2363_v23  ;;  %v2399_v35 = vld [vmem:[#allocation7 + $0x150] sm:$0xff]  ;;  %v2402_v36 = vld [vmem:[#allocation7 + $0xa0] sm:$0xff]  ;;  %v2404_v37 = vld [vmem:[#allocation7 + $0xa8] sm:$0xff] }
  0x1a   :  { %135 = vmatpush.msra.mxu0 %v2354_v20  ;;  %155 = vmatpush.msra.mxu1 %v2356_v21  ;;  %v2409_v38 = vld [vmem:[#allocation7 + $0xb8] sm:$0xff]  ;;  %v2411_v39 = vld [vmem:[#allocation7 + $0x130] sm:$0xff]  ;;  %v2414_v40 = vld [vmem:[#allocation7 + $0x80] sm:$0xff] }
  0x1b   :  { %195 = vmatpush.msra.mxu3 %v2361_v22  ;;  %172 = vmatpush.msra.mxu2 %v2375_v27  ;;  %v2416_v41 = vld [vmem:[#allocation7 + $0x88] sm:$0xff]  ;;  %v2421_v42 = vld [vmem:[#allocation7 + $0x98] sm:$0xff]  ;;  %v2423_v43 = vld [vmem:[#allocation7 + $0x110] sm:$0xff] }
  0x1c   :  { %136 = vmatpush.msra.mxu0 %v2366_v24  ;;  %156 = vmatpush.msra.mxu1 %v2368_v25  ;;  %v2426_v44 = vld [vmem:[#allocation7 + $0x60] sm:$0xff]  ;;  %v2428_v45 = vld [vmem:[#allocation7 + $0x68] sm:$0xff]  ;;  %v2433_v46 = vld [vmem:[#allocation7 + $0x78] sm:$0xff] }
  0x1d   :  { %196 = vmatpush.msra.mxu3 %v2373_v26  ;;  %173 = vmatpush.msra.mxu2 %v2387_v31  ;;  %v2435_v47 = vld [vmem:[#allocation7 + $0xf0] sm:$0xff]  ;;  %v2438_v48 = vld [vmem:[#allocation7 + $0x40] sm:$0xff]  ;;  %v2440_v49 = vld [vmem:[#allocation7 + $0x48] sm:$0xff] }
  0x1e   :  { %137 = vmatpush.msra.mxu0 %v2378_v28  ;;  %157 = vmatpush.msra.mxu1 %v2380_v29  ;;  %v2445_v50 = vld [vmem:[#allocation7 + $0x58] sm:$0xff]  ;;  %v2447_v51 = vld [vmem:[#allocation7 + $0xd0] sm:$0xff]  ;;  %v2450_v52 = vld [vmem:[#allocation7 + $0x20] sm:$0xff] }
  0x1f   :  { %197 = vmatpush.msra.mxu3 %v2385_v30  ;;  %174 = vmatpush.msra.mxu2 %v2399_v35  ;;  %v2452_v53 = vld [vmem:[#allocation7 + $0x28] sm:$0xff]  ;;  %v2458_v54 = vld [vmem:[%s3394_s1] sm:$0xff]  ;;  %v2462_v55 = vld [vmem:[#allocation7 + $0x38] sm:$0xff] }
  0x20   :  { %138 = vmatpush.msra.mxu0 %v2390_v32  ;;  %158 = vmatpush.msra.mxu1 %v2392_v33  ;;  %3451 = vst [vmem:[#allocation18_spill] sm:$0xff] %v2452_v53  ;;  %v2464_v56 = vld [vmem:[#allocation7 + $0xb0] sm:$0xff]  ;;  %v2467_v57 = vld [vmem:[#allocation7] sm:$0xff]  ;;  %v2469_v58 = vld [vmem:[#allocation7 + $0x8] sm:$0xff]  ;;  %vm1948_vm0 = vcmp.gt.s32.totalorder %v2458_v54, 0  ;;  %vm1952_vm1 = vcmp.gt.s32.totalorder %v2458_v54, 1 }
  0x21   :  { %198 = vmatpush.msra.mxu3 %v2397_v34  ;;  %175 = vmatpush.msra.mxu2 %v2411_v39  ;;  %3452 = vst [vmem:[#allocation19_spill] sm:$0xff] %v2458_v54  ;;  %v2474_v59 = vld [vmem:[#allocation7 + $0x18] sm:$0xff]  ;;  %v2481_v60 = vld [vmem:[#allocation7 + $0x90] sm:$0xff]  ;;  %v278_v63 = vsel %vm1948_vm0, 1, %v3405_v62  ;;  %vm1972_vm2 = vcmp.gt.s32.totalorder %v2458_v54, 6 }
  0x22   :  { %139 = vmatpush.msra.mxu0 %v2402_v36  ;;  %159 = vmatpush.msra.mxu1 %v2404_v37  ;;  %3453 = vst [vmem:[#allocation20_spill] sm:$0xff] %v2467_v57  ;;  %v2501_v62 = vld [vmem:[#allocation7 + $0x10] sm:$0xff] }
  0x23   :  { %199 = vmatpush.msra.mxu3 %v2409_v38  ;;  %176 = vmatpush.msra.mxu2 %v2423_v43  ;;  %3454 = vst [vmem:[#allocation21_spill] sm:$0xff] %v2474_v59 }
  0x24   :  { %140 = vmatpush.msra.mxu0 %v2414_v40  ;;  %160 = vmatpush.msra.mxu1 %v2416_v41 }
  0x25   :  { %200 = vmatpush.msra.mxu3 %v2421_v42  ;;  %177 = vmatpush.msra.mxu2 %v2435_v47 }
  0x26   :  { %141 = vmatpush.msra.mxu0 %v2426_v44  ;;  %161 = vmatpush.msra.mxu1 %v2428_v45 }
  0x27   :  { %201 = vmatpush.msra.mxu3 %v2433_v46  ;;  %178 = vmatpush.msra.mxu2 %v2447_v51 }
  0x28   :  { %142 = vmatpush.msra.mxu0 %v2438_v48  ;;  %162 = vmatpush.msra.mxu1 %v2440_v49 }
  0x29   :  { %202 = vmatpush.msra.mxu3 %v2445_v50  ;;  %179 = vmatpush.msra.mxu2 %v2464_v56 }
  0x2a   :  { %143 = vmatpush.msra.mxu0 %v2450_v52  ;;  %163 = vmatpush.msra.mxu1 %v2452_v53  ;;  %v2485_v53 = vld [vmem:[#allocation7 + $0x70] sm:$0xff] }
  0x2b   :  { %203 = vmatpush.msra.mxu3 %v2462_v55  ;;  %180 = vmatpush.msra.mxu2 %v2481_v60  ;;  %v3458_v54 = vld [vmem:[#allocation21_spill] sm:$0xff] }
  0x2c   :  { %144 = vmatpush.msra.mxu0 %v2467_v57  ;;  %164 = vmatpush.msra.mxu1 %v2469_v58  ;;  %v2489_v57 = vld [vmem:[#allocation7 + $0x50] sm:$0xff] }
  0x2d   :  { %204 = vmatpush.msra.mxu3 %v2474_v59  ;;  %145 = vmatmul.f32.vlgmr.msra.gmra.mxu0 %v2256_v61  ;;  %v2494_v59 = vld [vmem:[#allocation7 + $0x30] sm:$0xff] }
  0x2e   :  { %165 = vmatmul.f32.vlgmr.msra.gmra.mxu1 %v2256_v61  ;;  %205 = vmatmul.f32.vlgmr.msra.gmra.mxu3 %v2256_v61 }
  0x2f   :  { %280 = vperm.xlu0 %1992, %v278_v63   ;;  %356 = vmatpush.msrb.mxu0 %v2299_v0  ;;  %v3455_v63 = vmov 0  }
  0x30   :  { %181 = vmatpush.msra.mxu2 %v2485_v53  ;;  %376 = vmatpush.msrb.mxu1 %v2301_v1  ;;  %v506_v1 = vsel %vm1952_vm1, 1, %v3455_v63 }
  0x31   :  { %416 = vmatpush.msrb.mxu3 %v2303_v2  ;;  %357 = vmatpush.msrb.mxu0 %v2307_v3 }
  0x32   :  { %182 = vmatpush.msra.mxu2 %v2489_v57  ;;  %377 = vmatpush.msrb.mxu1 %v2309_v4 }
  0x33   :  { %417 = vmatpush.msrb.mxu3 %v2311_v5  ;;  %358 = vmatpush.msrb.mxu0 %v2314_v6 }
  0x34   :  { %183 = vmatpush.msra.mxu2 %v2494_v59  ;;  %378 = vmatpush.msrb.mxu1 %v2316_v7 }
  0x35   :  { %418 = vmatpush.msrb.mxu3 %v2320_v8  ;;  %359 = vmatpush.msrb.mxu0 %v2323_v9 }
  0x36   :  { %184 = vmatpush.msra.mxu2 %v2501_v62  ;;  %379 = vmatpush.msrb.mxu1 %v2325_v10 }
  0x37   :  { %185 = vmatmul.f32.vlgmr.msra.gmra.mxu2 %v2256_v61  ;;  %508 = vperm.xlu0 %1992, %v506_v1   ;;  %v1651_v1 = vsel %vm1972_vm2, 1, %v3455_v63  ;;  %v3456_v61 = vld [vmem:[#allocation18_spill] sm:$0xff]  ;;  %v3459_v63 = vld [vmem:[#allocation17_spill] sm:$0xff] }
  0x38   :  { %396 = vmatpush.msrb.mxu2 %v2345_v17  ;;  %419 = vmatpush.msrb.mxu3 %v2329_v11 }
  0x39   :  { %360 = vmatpush.msrb.mxu0 %v2332_v12  ;;  %380 = vmatpush.msrb.mxu1 %v2334_v13 }
  0x3a   :  { %397 = vmatpush.msrb.mxu2 %v2351_v19  ;;  %420 = vmatpush.msrb.mxu3 %v2338_v14 }
  0x3b   :  { %361 = vmatpush.msrb.mxu0 %v2341_v15  ;;  %381 = vmatpush.msrb.mxu1 %v2343_v16 }
  0x3c   :  { %398 = vmatpush.msrb.mxu2 %v2363_v23  ;;  %421 = vmatpush.msrb.mxu3 %v2349_v18 }
  0x3d   :  { %362 = vmatpush.msrb.mxu0 %v2354_v20  ;;  %382 = vmatpush.msrb.mxu1 %v2356_v21 }
  0x3e   :  { %399 = vmatpush.msrb.mxu2 %v2375_v27  ;;  %422 = vmatpush.msrb.mxu3 %v2361_v22 }
  0x3f   :  { %1653 = vperm.xlu0 %1992, %v1651_v1   ;;  %363 = vmatpush.msrb.mxu0 %v2366_v24  ;;  %v3457_v1 = vld [vmem:[#allocation20_spill] sm:$0xff] }
  0x40   :  { %400 = vmatpush.msrb.mxu2 %v2387_v31  ;;  %383 = vmatpush.msrb.mxu1 %v2368_v25 }
  0x41   :  { %423 = vmatpush.msrb.mxu3 %v2373_v26  ;;  %364 = vmatpush.msrb.mxu0 %v2378_v28 }
  0x42   :  { %401 = vmatpush.msrb.mxu2 %v2399_v35  ;;  %384 = vmatpush.msrb.mxu1 %v2380_v29 }
  0x43   :  { %424 = vmatpush.msrb.mxu3 %v2385_v30  ;;  %365 = vmatpush.msrb.mxu0 %v2390_v32 }
  0x44   :  { %402 = vmatpush.msrb.mxu2 %v2411_v39  ;;  %385 = vmatpush.msrb.mxu1 %v2392_v33 }
  0x45   :  { %425 = vmatpush.msrb.mxu3 %v2397_v34  ;;  %366 = vmatpush.msrb.mxu0 %v2402_v36 }
  0x46   :  { %403 = vmatpush.msrb.mxu2 %v2423_v43  ;;  %386 = vmatpush.msrb.mxu1 %v2404_v37 }
  0x47   :  { %426 = vmatpush.msrb.mxu3 %v2409_v38  ;;  %367 = vmatpush.msrb.mxu0 %v2414_v40 }
  0x48   :  { %404 = vmatpush.msrb.mxu2 %v2435_v47  ;;  %387 = vmatpush.msrb.mxu1 %v2416_v41 }
  0x49   :  { %427 = vmatpush.msrb.mxu3 %v2421_v42  ;;  %368 = vmatpush.msrb.mxu0 %v2426_v44 }
  0x4a   :  { %405 = vmatpush.msrb.mxu2 %v2447_v51  ;;  %388 = vmatpush.msrb.mxu1 %v2428_v45 }
  0x4b   :  { %428 = vmatpush.msrb.mxu3 %v2433_v46  ;;  %369 = vmatpush.msrb.mxu0 %v2438_v48 }
  0x4c   :  { %406 = vmatpush.msrb.mxu2 %v2464_v56  ;;  %389 = vmatpush.msrb.mxu1 %v2440_v49 }
  0x4d   :  { %429 = vmatpush.msrb.mxu3 %v2445_v50  ;;  %370 = vmatpush.msrb.mxu0 %v2450_v52 }
  0x4e   :  { %407 = vmatpush.msrb.mxu2 %v2481_v60  ;;  %390 = vmatpush.msrb.mxu1 %v3456_v61 }
  0x4f   :  { %430 = vmatpush.msrb.mxu3 %v2462_v55  ;;  %371 = vmatpush.msrb.mxu0 %v3457_v1 }
  0x50   :  { %408 = vmatpush.msrb.mxu2 %v2485_v53  ;;  %391 = vmatpush.msrb.mxu1 %v2469_v58 }
  0x51   :  { %431 = vmatpush.msrb.mxu3 %v3458_v54  ;;  %585 = vmatpush.msra.mxu0 %v2299_v0  ;;  %v3460_v0 = vmov 0  }
  0x52   :  { %409 = vmatpush.msrb.mxu2 %v2489_v57  ;;  %605 = vmatpush.msra.mxu1 %v3459_v63  ;;  %v288_v63 = vld [vmem:[#allocation4 + $0x20] sm:$0xff] }
  0x53   :  { %645 = vmatpush.msra.mxu3 %v2303_v2  ;;  %586 = vmatpush.msra.mxu0 %v2307_v3  ;;  %v61_v2 = vld [vmem:[#allocation4] sm:$0xff]  ;;  %v62_v3 = vld [vmem:[#allocation4 + $0x8] sm:$0xff] }
  0x54   :  { %410 = vmatpush.msrb.mxu2 %v2494_v59  ;;  %606 = vmatpush.msra.mxu1 %v2309_v4 }
  0x55   :  { %646 = vmatpush.msra.mxu3 %v2311_v5  ;;  %587 = vmatpush.msra.mxu0 %v2314_v6 }
  0x56   :  { %411 = vmatpush.msrb.mxu2 %v2501_v62  ;;  %607 = vmatpush.msra.mxu1 %v2316_v7 }
  0x57   :  { %647 = vmatpush.msra.mxu3 %v2320_v8  ;;  %588 = vmatpush.msra.mxu0 %v2323_v9 }
  0x58   :  { %625 = vmatpush.msra.mxu2 %v2345_v17  ;;  %608 = vmatpush.msra.mxu1 %v2325_v10  ;;  %v64_v10 = vld [vmem:[#allocation4 + $0x18] sm:$0xff] }
  0x59   :  { %648 = vmatpush.msra.mxu3 %v2329_v11  ;;  %589 = vmatpush.msra.mxu0 %v2332_v12 }
  0x5a   :  { %626 = vmatpush.msra.mxu2 %v2351_v19  ;;  %609 = vmatpush.msra.mxu1 %v2334_v13 }
  0x5b   :  { %649 = vmatpush.msra.mxu3 %v2338_v14  ;;  %590 = vmatpush.msra.mxu0 %v2341_v15 }
  0x5c   :  { %627 = vmatpush.msra.mxu2 %v2363_v23  ;;  %610 = vmatpush.msra.mxu1 %v2343_v16 }
  0x5d   :  { %650 = vmatpush.msra.mxu3 %v2349_v18  ;;  %591 = vmatpush.msra.mxu0 %v2354_v20  ;;  %v63_v18 = vld [vmem:[#allocation4 + $0x10] sm:$0xff] }
  0x5e   :  { %628 = vmatpush.msra.mxu2 %v2375_v27  ;;  %611 = vmatpush.msra.mxu1 %v2356_v21 }
  0x5f   :  { %651 = vmatpush.msra.mxu3 %v2361_v22  ;;  %592 = vmatpush.msra.mxu0 %v2366_v24 }
  0x60   :  { %629 = vmatpush.msra.mxu2 %v2387_v31  ;;  %612 = vmatpush.msra.mxu1 %v2368_v25 }
  0x61   :  { %652 = vmatpush.msra.mxu3 %v2373_v26  ;;  %593 = vmatpush.msra.mxu0 %v2378_v28 }
  0x62   :  { %630 = vmatpush.msra.mxu2 %v2399_v35  ;;  %613 = vmatpush.msra.mxu1 %v2380_v29 }
  0x63   :  { %653 = vmatpush.msra.mxu3 %v2385_v30  ;;  %594 = vmatpush.msra.mxu0 %v2390_v32 }
  0x64   :  { %631 = vmatpush.msra.mxu2 %v2411_v39  ;;  %614 = vmatpush.msra.mxu1 %v2392_v33 }
  0x65   :  { %654 = vmatpush.msra.mxu3 %v2397_v34  ;;  %595 = vmatpush.msra.mxu0 %v2402_v36 }
  0x66   :  { %632 = vmatpush.msra.mxu2 %v2423_v43  ;;  %615 = vmatpush.msra.mxu1 %v2404_v37 }
  0x67   :  { %655 = vmatpush.msra.mxu3 %v2409_v38  ;;  %596 = vmatpush.msra.mxu0 %v2414_v40 }
  0x68   :  { %633 = vmatpush.msra.mxu2 %v2435_v47  ;;  %616 = vmatpush.msra.mxu1 %v2416_v41 }
  0x69   :  { %656 = vmatpush.msra.mxu3 %v2421_v42  ;;  %597 = vmatpush.msra.mxu0 %v2426_v44 }
  0x6a   :  { %634 = vmatpush.msra.mxu2 %v2447_v51  ;;  %617 = vmatpush.msra.mxu1 %v2428_v45 }
  0x6b   :  { %657 = vmatpush.msra.mxu3 %v2433_v46  ;;  %598 = vmatpush.msra.mxu0 %v2438_v48 }
  0x6c   :  { %635 = vmatpush.msra.mxu2 %v2464_v56  ;;  %618 = vmatpush.msra.mxu1 %v2440_v49 }
  0x6d   :  { %658 = vmatpush.msra.mxu3 %v2445_v50  ;;  %599 = vmatpush.msra.mxu0 %v2450_v52 }
  0x6e   :  { %636 = vmatpush.msra.mxu2 %v2481_v60  ;;  %619 = vmatpush.msra.mxu1 %v3456_v61  ;;  %v289_v61 = vld [vmem:[#allocation4 + $0x28] sm:$0xff] }
  0x6f   :  { %659 = vmatpush.msra.mxu3 %v2462_v55  ;;  %600 = vmatpush.msra.mxu0 %v3457_v1 }
  0x70   :  { %637 = vmatpush.msra.mxu2 %v2485_v53  ;;  %620 = vmatpush.msra.mxu1 %v2469_v58 }
  0x71   :  { %660 = vmatpush.msra.mxu3 %v3458_v54  ;;  %1993 = vset.pattern.permute.xlu1 %v3460_v0 }
  0x72   :  { %638 = vmatpush.msra.mxu2 %v2489_v57  ;;  %1994 = vset.pattern.permute.xlu2 %v3460_v0 }
  0x74   :  { %639 = vmatpush.msra.mxu2 %v2494_v59 }
  0x76   :  { %640 = vmatpush.msra.mxu2 %v2501_v62 }
  0xa1   :  { %v281_v50 = vpop.permute.xlu0 %280 }
  0xa2   :  { %vm282_vm11 = vcmp.eq.s32.totalorder %v281_v50, 1 }
  0xaa   :  { %v146_v4 = vpop.f32.mrf.mxu0 }
  0xab   :  { %v209_v5 = vadd.f32 %v146_v4, %v61_v2  ;;  %v166_v6 = vpop.f32.mrf.mxu1 }
  0xac   :  { %v210_v7 = vadd.f32 %v166_v6, %v62_v3 }
  0xad   :  { %v1945_v8 = vmul.f32 -1.442695, %v209_v5 }
  0xae   :  { %v1946_v9 = vmul.f32 -1.442695, %v210_v7  ;;  %v291_v7 = vld [vmem:[#allocation4 + $0x38] sm:$0xff] }
  0xaf   :  { %1995 = vpow2.f32 %v1945_v8 }
  0xb0   :  { %1997 = vpow2.f32 %v1946_v9 }
  0xb1   :  { %v206_v11 = vpop.f32.mrf.mxu3 }
  0xb2   :  { %v212_v12 = vadd.f32 %v206_v11, %v64_v10 }
  0xb4   :  { %v1947_v13 = vmul.f32 -1.442695, %v212_v12 }
  0xb5   :  { %v1996_v14 = vpop.eup %1995 }
  0xb6   :  { %v1998_v15 = vpop.eup %1997  ;;  %v216_v16 = vadd.f32 1.0, %v1996_v14  ;;  %1999 = vpow2.f32 %v1947_v13 }
  0xb7   :  { %v235_v17 = vadd.f32 1.0, %v1998_v15  ;;  %v3461_v15 = vld [vmem:[#allocation19_spill] sm:$0xff] }
  0xb8   :  { %2001 = vrcp.f32 %v216_v16  ;;  %v228_v29 = vand.u32 2147483648, %v216_v16  ;;  %v226_v32 = vand.u32 2147483647, %v216_v16  ;;  %vm222_vm5 = vweird.f32 %v216_v16 }
  0xb9   :  { %2003 = vrcp.f32 %v235_v17  ;;  %v247_v30 = vand.u32 2147483648, %v235_v17  ;;  %v245_v34 = vand.u32 2147483647, %v235_v17  ;;  %vm241_vm6 = vweird.f32 %v235_v17 }
  0xba   :  { %v186_v19 = vpop.f32.mrf.mxu2  ;;  %v229_v39 = vor.u32 1.1754944e-38, %v228_v29  ;;  %vm227_vm8 = vcmp.eq.f32.partialorder %v226_v32, 8.507059e+37  ;;  %vm1956_vm0 = vcmp.gt.s32.totalorder %v3461_v15, 2  ;;  %vm1960_vm1 = vcmp.gt.s32.totalorder %v3461_v15, 3 }
  0xbb   :  { %v211_v21 = vadd.f32 %v186_v19, %v63_v18  ;;  %v248_v41 = vor.u32 1.1754944e-38, %v247_v30  ;;  %vm246_vm10 = vcmp.eq.f32.partialorder %v245_v34, 8.507059e+37  ;;  %v735_v18 = vsel %vm1956_vm0, 1, %v3460_v0 }
  0xbc   :  { %v2000_v20 = vpop.eup %1999  ;;  %737 = vperm.xlu1 %1993, %v735_v18   ;;  %v2714_v18 = vld [vmem:[#allocation7 + $0x168] sm:$0xff] }
  0xbd   :  { %v255_v22 = vadd.f32 1.0, %v2000_v20 }
  0xbe   :  { %v2002_v23 = vpop.eup %2001 }
  0xbf   :  { %v2004_v24 = vpop.eup %2003  ;;  %v218_v25 = vmul.f32 %v2002_v23, %v216_v16  ;;  %2005 = vrcp.f32 %v255_v22  ;;  %vm223_vm3 = vweird.f32 %v2002_v23  ;;  %v267_v53 = vand.u32 2147483648, %v255_v22  ;;  %v290_v16 = vld [vmem:[#allocation4 + $0x30] sm:$0xff] }
  0xc0   :  { %v237_v26 = vmul.f32 %v2004_v24, %v235_v17  ;;  %2007 = vtanh.f32 %v211_v21  ;;  %vm242_vm4 = vweird.f32 %v2004_v24  ;;  %vm224_vm7 = vmor %vm222_vm5, %vm223_vm3  ;;  %vm261_vm13 = vweird.f32 %v255_v22 }
  0xc1   :  { %v219_v27 = vsub.f32 1.0, %v218_v25  ;;  %vm243_vm9 = vmor %vm241_vm6, %vm242_vm4  ;;  %v265_v55 = vand.u32 2147483647, %v255_v22  ;;  %v268_v57 = vor.u32 1.1754944e-38, %v267_v53 }
  0xc2   :  { %v238_v28 = vsub.f32 1.0, %v237_v26 }
  0xc3   :  { %v220_v31 = vmul.f32 %v2002_v23, %v219_v27  ;;  %vm266_vm15 = vcmp.eq.f32.partialorder %v265_v55, 8.507059e+37  ;;  %v964_v27 = vsel %vm1960_vm1, 1, %v3460_v0 }
  0xc4   :  { %v239_v33 = vmul.f32 %v2004_v24, %v238_v28  ;;  %966 = vperm.xlu1 %1993, %v964_v27   ;;  %v2740_v27 = vld [vmem:[#allocation7 + $0x130] sm:$0xff] }
  0xc5   :  { %v2006_v35 = vpop.eup %2005  ;;  %v221_v36 = vadd.f32 %v2002_v23, %v220_v31 }
  0xc6   :  { %v2008_v37 = vpop.eup %2007  ;;  %v257_v38 = vmul.f32 %v2006_v35, %v255_v22  ;;  %v240_v40 = vadd.f32 %v2004_v24, %v239_v33  ;;  %vm262_vm12 = vweird.f32 %v2006_v35 }
  0xc7   :  { %v225_v42 = vsel %vm224_vm7, %v2002_v23, %v221_v36  ;;  %vm263_vm14 = vmor %vm261_vm13, %vm262_vm12  ;;  %vm1976_vm7 = vcmp.gt.s32.totalorder %v3461_v15, 7  ;;  %v2704_v15 = vld [vmem:[#allocation7 + $0x190] sm:$0xff] }
  0xc8   :  { %v258_v43 = vsub.f32 1.0, %v257_v38  ;;  %v230_v44 = vsel %vm227_vm8, %v229_v39, %v225_v42  ;;  %v244_v45 = vsel %vm243_vm9, %v2004_v24, %v240_v40 }
  0xc9   :  { %v249_v46 = vsel %vm246_vm10, %v248_v41, %v244_v45  ;;  %v272_v47 = vmul.f32 %v2008_v37, %v230_v44 }
  0xca   :  { %v259_v48 = vmul.f32 %v2006_v35, %v258_v43  ;;  %v271_v49 = vmul.f32 0.0, %v249_v46 }
  0xcc   :  { %v273_v51 = vadd.f32 %v272_v47, %v271_v49  ;;  %v260_v52 = vadd.f32 %v2006_v35, %v259_v48  ;;  %v1880_v48 = vsel %vm1976_vm7, 1, %v3460_v0  ;;  %v2836_v0 = vld [vmem:[#allocation7 + $0x30] sm:$0xff] }
  0xcd   :  { %1882 = vperm.xlu1 %1993, %v1880_v48  }
  0xce   :  { %2009 = vtanh.f32 %v273_v51  ;;  %v2634_v54 = vsel %vm282_vm11, %v273_v51, 0.0  ;;  %v264_v56 = vsel %vm263_vm14, %v2006_v35, %v260_v52  ;;  %v509_v51 = vpop.permute.xlu0 %508 }
  0xcf   :  { %v269_v59 = vsel %vm266_vm15, %v268_v57, %v264_v56 }
  0xd4   :  { %v2010_v58 = vpop.eup %2009 }
  0xd5   :  { %v275_v60 = vmul.f32 %v2010_v58, %v269_v59 }
  0xd7   :  { %1977 = vmatmul.msk.f32.vlgmr.msrb.gmra.mxu0 %vm282_vm11, %v275_v60  ;;  %1978 = vmatmul.msk.f32.vlgmr.msrb.gmra.mxu1 %vm282_vm11, %v275_v60  ;;  %v2639_v62 = vsel %vm282_vm11, %v275_v60, 0.0 }
  0xd8   :  { %1979 = vmatmul.msk.f32.vlgmr.msrb.gmra.mxu2 %vm282_vm11, %v275_v60  ;;  %1980 = vmatmul.msk.f32.vlgmr.msrb.gmra.mxu3 %vm282_vm11, %v275_v60  ;;  %286 = vst [vmem:[#allocation9] sm:$0xff] %v2639_v62  ;;  %vm510_vm11 = vcmp.eq.s32.totalorder %v509_v51, 1  ;;  %v520_v51 = vld [vmem:[#allocation4 + $0x58] sm:$0xff] }
 0x154   :  { %v373_v1 = vpop.f32.mrf.mxu0  ;;  %v393_v2 = vpop.f32.mrf.mxu1 }
 0x155   :  { %v436_v3 = vadd.f32 %v373_v1, %v288_v63  ;;  %v437_v4 = vadd.f32 %v393_v2, %v289_v61 }
 0x157   :  { %v1949_v5 = vmul.f32 -1.442695, %v436_v3  ;;  %v1950_v6 = vmul.f32 -1.442695, %v437_v4  ;;  %v2666_v3 = vld [vmem:[#allocation7 + $0x1e8] sm:$0xff]  ;;  %v2668_v4 = vld [vmem:[#allocation7 + $0x1f0] sm:$0xff] }
 0x158   :  { %3464 = vst [vmem:[#allocation21_spill] sm:$0xff] %v2668_v4  ;;  %834 = vmatpush.msrb.mxu1 %v2666_v3  ;;  %854 = vmatpush.msrb.mxu2 %v2668_v4 }
 0x159   :  { %2011 = vpow2.f32 %v1949_v5  ;;  %v2676_v5 = vld [vmem:[#allocation7 + $0x1c0] sm:$0xff] }
 0x15a   :  { %2013 = vpow2.f32 %v1950_v6  ;;  %v2678_v6 = vld [vmem:[#allocation7 + $0x1c8] sm:$0xff] }
 0x15b   :  { %v433_v8 = vpop.f32.mrf.mxu3  ;;  %v413_v17 = vpop.f32.mrf.mxu2  ;;  %835 = vmatpush.msrb.mxu1 %v2678_v6 }
 0x15c   :  { %v439_v9 = vadd.f32 %v433_v8, %v291_v7  ;;  %v438_v22 = vadd.f32 %v413_v17, %v290_v16  ;;  %v2680_v7 = vld [vmem:[#allocation7 + $0x1d0] sm:$0xff]  ;;  %v2684_v8 = vld [vmem:[#allocation7 + $0x1d8] sm:$0xff]  ;;  %v2712_v17 = vld [vmem:[#allocation7 + $0x160] sm:$0xff] }
 0x15d   :  { %855 = vmatpush.msrb.mxu2 %v2680_v7  ;;  %v2708_v16 = vld [vmem:[#allocation7 + $0x198] sm:$0xff] }
 0x15e   :  { %v1951_v10 = vmul.f32 -1.442695, %v439_v9  ;;  %v2688_v9 = vld [vmem:[#allocation7 + $0x1a0] sm:$0xff] }
 0x15f   :  { %v2012_v11 = vpop.eup %2011 }
 0x160   :  { %v2014_v12 = vpop.eup %2013  ;;  %v443_v13 = vadd.f32 1.0, %v2012_v11  ;;  %2015 = vpow2.f32 %v1951_v10  ;;  %v2690_v10 = vld [vmem:[#allocation7 + $0x1a8] sm:$0xff]  ;;  %v2692_v11 = vld [vmem:[#allocation7 + $0x1b0] sm:$0xff] }
 0x161   :  { %v462_v14 = vadd.f32 1.0, %v2014_v12  ;;  %3466 = vst [vmem:[#allocation19_spill] sm:$0xff] %v2690_v10  ;;  %836 = vmatpush.msrb.mxu1 %v2690_v10  ;;  %v2696_v12 = vld [vmem:[#allocation7 + $0x1b8] sm:$0xff]  ;;  %856 = vmatpush.msrb.mxu2 %v2692_v11 }
 0x162   :  { %2017 = vrcp.f32 %v443_v13  ;;  %v455_v29 = vand.u32 2147483648, %v443_v13  ;;  %v453_v32 = vand.u32 2147483647, %v443_v13  ;;  %vm449_vm5 = vweird.f32 %v443_v13  ;;  %3467 = vst [vmem:[#allocation22_spill] sm:$0xff] %v2692_v11 }
 0x163   :  { %2019 = vrcp.f32 %v462_v14  ;;  %v474_v30 = vand.u32 2147483648, %v462_v14  ;;  %v472_v34 = vand.u32 2147483647, %v462_v14  ;;  %vm468_vm4 = vweird.f32 %v462_v14  ;;  %3468 = vst [vmem:[#allocation23_spill] sm:$0xff] %v2696_v12  ;;  %857 = vmatpush.msrb.mxu2 %v2704_v15 }
 0x164   :  { %v456_v37 = vor.u32 1.1754944e-38, %v455_v29  ;;  %vm454_vm9 = vcmp.eq.f32.partialorder %v453_v32, 8.507059e+37  ;;  %v2748_v29 = vld [vmem:[#allocation7 + $0x100] sm:$0xff] }
 0x165   :  { %v475_v40 = vor.u32 1.1754944e-38, %v474_v30  ;;  %vm473_vm10 = vcmp.eq.f32.partialorder %v472_v34, 8.507059e+37  ;;  %v2750_v30 = vld [vmem:[#allocation7 + $0x108] sm:$0xff]  ;;  %v517_v32 = vld [vmem:[#allocation4 + $0x40] sm:$0xff]  ;;  %v2756_v34 = vld [vmem:[#allocation7 + $0x118] sm:$0xff] }
 0x166   :  { %v2016_v19 = vpop.eup %2015 }
 0x167   :  { %v482_v20 = vadd.f32 1.0, %v2016_v19  ;;  %v2716_v19 = vld [vmem:[#allocation7 + $0x170] sm:$0xff] }
 0x168   :  { %v2018_v21 = vpop.eup %2017  ;;  %3470 = vst [vmem:[#allocation25_spill] sm:$0xff] %v2716_v19  ;;  %858 = vmatpush.msrb.mxu2 %v2716_v19 }
 0x169   :  { %v2020_v23 = vpop.eup %2019  ;;  %v445_v24 = vmul.f32 %v2018_v21, %v443_v13  ;;  %2021 = vrcp.f32 %v482_v20  ;;  %vm450_vm2 = vweird.f32 %v2018_v21  ;;  %v494_v55 = vand.u32 2147483648, %v482_v20  ;;  %v2700_v13 = vld [vmem:[#allocation7 + $0x180] sm:$0xff] }
 0x16a   :  { %v464_v25 = vmul.f32 %v2020_v23, %v462_v14  ;;  %2023 = vtanh.f32 %v438_v22  ;;  %vm469_vm3 = vweird.f32 %v2020_v23  ;;  %vm451_vm6 = vmor %vm449_vm5, %vm450_vm2  ;;  %vm488_vm13 = vweird.f32 %v482_v20  ;;  %3469 = vst [vmem:[#allocation24_spill] sm:$0xff] %v2700_v13  ;;  %v2702_v14 = vld [vmem:[#allocation7 + $0x188] sm:$0xff] }
 0x16b   :  { %v446_v26 = vsub.f32 1.0, %v445_v24  ;;  %vm470_vm8 = vmor %vm468_vm4, %vm469_vm3  ;;  %v492_v57 = vand.u32 2147483647, %v482_v20  ;;  %v495_v59 = vor.u32 1.1754944e-38, %v494_v55  ;;  %837 = vmatpush.msrb.mxu1 %v2702_v14  ;;  %v2726_v22 = vld [vmem:[#allocation7 + $0x148] sm:$0xff]  ;;  %v2732_v24 = vld [vmem:[#allocation7 + $0x158] sm:$0xff] }
 0x16c   :  { %v465_v28 = vsub.f32 1.0, %v464_v25  ;;  %3472 = vst [vmem:[#allocation27_spill] sm:$0xff] %v2726_v22  ;;  %v2736_v25 = vld [vmem:[#allocation7 + $0x120] sm:$0xff] }
 0x16d   :  { %v447_v31 = vmul.f32 %v2018_v21, %v446_v26  ;;  %vm493_vm15 = vcmp.eq.f32.partialorder %v492_v57, 8.507059e+37  ;;  %838 = vmatpush.msrb.mxu1 %v2714_v18  ;;  %3474 = vst [vmem:[#allocation29_spill] sm:$0xff] %v2732_v24  ;;  %v2738_v26 = vld [vmem:[#allocation7 + $0x128] sm:$0xff]  ;;  %v2796_v55 = vld [vmem:[#allocation7 + $0x80] sm:$0xff] }
 0x16e   :  { %v466_v33 = vmul.f32 %v2020_v23, %v465_v28  ;;  %v2744_v28 = vld [vmem:[#allocation7 + $0x138] sm:$0xff]  ;;  %v2798_v57 = vld [vmem:[#allocation7 + $0x88] sm:$0xff] }
 0x16f   :  { %v2022_v35 = vpop.eup %2021  ;;  %v448_v36 = vadd.f32 %v2018_v21, %v447_v31  ;;  %839 = vmatpush.msrb.mxu1 %v2726_v22  ;;  %v2752_v31 = vld [vmem:[#allocation7 + $0x110] sm:$0xff] }
 0x170   :  { %v467_v38 = vadd.f32 %v2020_v23, %v466_v33  ;;  %v484_v39 = vmul.f32 %v2022_v35, %v482_v20  ;;  %v2024_v42 = vpop.eup %2023  ;;  %vm489_vm12 = vweird.f32 %v2022_v35  ;;  %v2720_v20 = vld [vmem:[#allocation7 + $0x178] sm:$0xff]  ;;  %v518_v33 = vld [vmem:[#allocation4 + $0x48] sm:$0xff] }
 0x171   :  { %v452_v41 = vsel %vm451_vm6, %v2018_v21, %v448_v36  ;;  %vm490_vm14 = vmor %vm488_vm13, %vm489_vm12  ;;  %3471 = vst [vmem:[#allocation26_spill] sm:$0xff] %v2720_v20  ;;  %v2724_v21 = vld [vmem:[#allocation7 + $0x140] sm:$0xff]  ;;  %840 = vmatpush.msrb.mxu1 %v2738_v26  ;;  %v2762_v36 = vld [vmem:[#allocation7 + $0xe8] sm:$0xff] }
 0x172   :  { %v457_v43 = vsel %vm454_vm9, %v456_v37, %v452_v41  ;;  %v471_v44 = vsel %vm470_vm8, %v2020_v23, %v467_v38  ;;  %v485_v45 = vsub.f32 1.0, %v484_v39  ;;  %v2728_v23 = vld [vmem:[#allocation7 + $0x150] sm:$0xff] }
 0x173   :  { %v476_v46 = vsel %vm473_vm10, %v475_v40, %v471_v44  ;;  %v499_v47 = vmul.f32 %v2024_v42, %v457_v43  ;;  %3473 = vst [vmem:[#allocation28_spill] sm:$0xff] %v2728_v23  ;;  %859 = vmatpush.msrb.mxu2 %v2728_v23  ;;  %841 = vmatpush.msrb.mxu1 %v2750_v30  ;;  %v2764_v37 = vld [vmem:[#allocation7 + $0xf0] sm:$0xff]  ;;  %v2768_v40 = vld [vmem:[#allocation7 + $0xf8] sm:$0xff]  ;;  %v2772_v43 = vld [vmem:[#allocation7 + $0xc0] sm:$0xff] }
 0x174   :  { %v498_v49 = vmul.f32 %v476_v46, %v2634_v54  ;;  %v486_v50 = vmul.f32 %v2022_v35, %v485_v45  ;;  %v2774_v44 = vld [vmem:[#allocation7 + $0xc8] sm:$0xff]  ;;  %v2776_v45 = vld [vmem:[#allocation7 + $0xd0] sm:$0xff]  ;;  %v2780_v46 = vld [vmem:[#allocation7 + $0xd8] sm:$0xff] }
 0x175   :  { %860 = vmatpush.msrb.mxu2 %v2740_v27  ;;  %842 = vmatpush.msrb.mxu1 %v2762_v36 }
 0x176   :  { %v500_v52 = vadd.f32 %v499_v47, %v498_v49  ;;  %v487_v53 = vadd.f32 %v2022_v35, %v486_v50  ;;  %v2784_v49 = vld [vmem:[#allocation7 + $0xa0] sm:$0xff]  ;;  %v2786_v50 = vld [vmem:[#allocation7 + $0xa8] sm:$0xff] }
 0x177   :  { %861 = vmatpush.msrb.mxu2 %v2752_v31  ;;  %843 = vmatpush.msrb.mxu1 %v2774_v44 }
 0x178   :  { %2025 = vtanh.f32 %v500_v52  ;;  %v2653_v56 = vsel %vm510_vm11, %v500_v52, %v2634_v54  ;;  %v491_v58 = vsel %vm490_vm14, %v2022_v35, %v487_v53  ;;  %v2664_v54 = vld [vmem:[#allocation7 + $0x1e0] sm:$0xff]  ;;  %v2790_v52 = vld [vmem:[#allocation7 + $0xb0] sm:$0xff]  ;;  %v2792_v53 = vld [vmem:[#allocation7 + $0xb8] sm:$0xff] }
 0x179   :  { %v496_v63 = vsel %vm493_vm15, %v495_v59, %v491_v58  ;;  %3463 = vst [vmem:[#allocation20_spill] sm:$0xff] %v2664_v54  ;;  %814 = vmatpush.msrb.mxu0 %v2664_v54  ;;  %v2760_v35 = vld [vmem:[#allocation7 + $0xe0] sm:$0xff]  ;;  %862 = vmatpush.msrb.mxu2 %v2764_v37  ;;  %v2800_v58 = vld [vmem:[#allocation7 + $0x90] sm:$0xff]  ;;  %v2804_v59 = vld [vmem:[#allocation7 + $0x98] sm:$0xff] }
 0x17a   :  { %844 = vmatpush.msrb.mxu1 %v2786_v50 }
 0x17b   :  { %815 = vmatpush.msrb.mxu0 %v2676_v5  ;;  %863 = vmatpush.msrb.mxu2 %v2776_v45 }
 0x17c   :  { %845 = vmatpush.msrb.mxu1 %v2798_v57 }
 0x17d   :  { %816 = vmatpush.msrb.mxu0 %v2688_v9  ;;  %864 = vmatpush.msrb.mxu2 %v2790_v52 }
 0x17e   :  { %v2026_v60 = vpop.eup %2025 }
 0x17f   :  { %v502_v61 = vmul.f32 %v2026_v60, %v496_v63  ;;  %817 = vmatpush.msrb.mxu0 %v2700_v13  ;;  %865 = vmatpush.msrb.mxu2 %v2800_v58  ;;  %v2808_v63 = vld [vmem:[#allocation7 + $0x60] sm:$0xff] }
 0x181   :  { %v2657_v1 = vsel %vm510_vm11, %v502_v61, %v2639_v62  ;;  %v513_v2 = vsel %vm510_vm11, %v502_v61, 0.0  ;;  %v2672_v62 = vld [vmem:[#allocation7 + $0x1f8] sm:$0xff]  ;;  %818 = vmatpush.msrb.mxu0 %v2712_v17  ;;  %v2810_v61 = vld [vmem:[#allocation7 + $0x68] sm:$0xff] }
 0x182   :  { %3462 = vst [vmem:[#allocation18_spill] sm:$0xff] %v2657_v1  ;;  %601 = vmatmul.f32.vlgmr.msra.gmra.mxu0 %v2657_v1  ;;  %621 = vmatmul.f32.vlgmr.msra.gmra.mxu1 %v2657_v1 }
 0x183   :  { %515 = vst [vmem:[#allocation9 + $0x8] sm:$0xff] %v513_v2  ;;  %641 = vmatmul.f32.vlgmr.msra.gmra.mxu2 %v2657_v1  ;;  %661 = vmatmul.f32.vlgmr.msra.gmra.mxu3 %v2657_v1  ;;  %v2812_v2 = vld [vmem:[#allocation7 + $0x70] sm:$0xff] }
 0x184   :  { %3465 = vst [vmem:[#allocation17_spill] sm:$0xff] %v2672_v62  ;;  %874 = vmatpush.msrb.mxu3 %v2672_v62  ;;  %819 = vmatpush.msrb.mxu0 %v2724_v21 }
 0x185   :  { %846 = vmatpush.msrb.mxu1 %v2810_v61  ;;  %866 = vmatpush.msrb.mxu2 %v2812_v2 }
 0x186   :  { %875 = vmatpush.msrb.mxu3 %v2684_v8  ;;  %820 = vmatpush.msrb.mxu0 %v2736_v25 }
 0x188   :  { %876 = vmatpush.msrb.mxu3 %v2696_v12  ;;  %821 = vmatpush.msrb.mxu0 %v2748_v29 }
 0x18a   :  { %877 = vmatpush.msrb.mxu3 %v2708_v16  ;;  %822 = vmatpush.msrb.mxu0 %v2760_v35 }
 0x18c   :  { %878 = vmatpush.msrb.mxu3 %v2720_v20  ;;  %823 = vmatpush.msrb.mxu0 %v2772_v43 }
 0x18e   :  { %879 = vmatpush.msrb.mxu3 %v2732_v24  ;;  %824 = vmatpush.msrb.mxu0 %v2784_v49 }
 0x190   :  { %880 = vmatpush.msrb.mxu3 %v2744_v28  ;;  %825 = vmatpush.msrb.mxu0 %v2796_v55 }
 0x192   :  { %881 = vmatpush.msrb.mxu3 %v2756_v34  ;;  %826 = vmatpush.msrb.mxu0 %v2808_v63 }
 0x194   :  { %882 = vmatpush.msrb.mxu3 %v2768_v40 }
 0x196   :  { %883 = vmatpush.msrb.mxu3 %v2780_v46 }
 0x198   :  { %884 = vmatpush.msrb.mxu3 %v2792_v53 }
 0x19a   :  { %885 = vmatpush.msrb.mxu3 %v2804_v59 }
 0x1ff   :  { %v602_v38 = vpop.f32.mrf.mxu0  ;;  %v622_v39 = vpop.f32.mrf.mxu1 }
 0x200   :  { %v665_v41 = vadd.f32 %v602_v38, %v517_v32  ;;  %v666_v42 = vadd.f32 %v622_v39, %v518_v33  ;;  %v2816_v33 = vld [vmem:[#allocation7 + $0x78] sm:$0xff]  ;;  %v2820_v38 = vld [vmem:[#allocation7 + $0x40] sm:$0xff]  ;;  %v2822_v39 = vld [vmem:[#allocation7 + $0x48] sm:$0xff] }
 0x201   :  { %3475 = vst [vmem:[#allocation30_spill] sm:$0xff] %v2816_v33  ;;  %886 = vmatpush.msrb.mxu3 %v2816_v33  ;;  %827 = vmatpush.msrb.mxu0 %v2820_v38 }
 0x202   :  { %v1953_v47 = vmul.f32 -1.442695, %v665_v41  ;;  %v1954_v48 = vmul.f32 -1.442695, %v666_v42  ;;  %3476 = vst [vmem:[#allocation31_spill] sm:$0xff] %v2820_v38  ;;  %v2824_v41 = vld [vmem:[#allocation7 + $0x50] sm:$0xff]  ;;  %847 = vmatpush.msrb.mxu1 %v2822_v39 }
 0x203   :  { %3477 = vst [vmem:[#allocation32_spill] sm:$0xff] %v2822_v39  ;;  %867 = vmatpush.msrb.mxu2 %v2824_v41  ;;  %v2852_v38 = vld [vmem:[#allocation7 + $0x10] sm:$0xff] }
 0x204   :  { %2027 = vpow2.f32 %v1953_v47  ;;  %3478 = vst [vmem:[#allocation33_spill] sm:$0xff] %v2824_v41  ;;  %v2828_v47 = vld [vmem:[#allocation7 + $0x58] sm:$0xff]  ;;  %v2850_v41 = vld [vmem:[#allocation7 + $0x8] sm:$0xff] }
 0x205   :  { %2029 = vpow2.f32 %v1954_v48  ;;  %3479 = vst [vmem:[#allocation34_spill] sm:$0xff] %v2828_v47  ;;  %887 = vmatpush.msrb.mxu3 %v2828_v47  ;;  %868 = vmatpush.msrb.mxu2 %v2836_v0  ;;  %v2848_v47 = vld [vmem:[#allocation7] sm:$0xff] }
 0x206   :  { %v662_v60 = vpop.f32.mrf.mxu3  ;;  %3480 = vst [vmem:[#allocation35_spill] sm:$0xff] %v2848_v47 }
 0x207   :  { %v668_v32 = vadd.f32 %v662_v60, %v520_v51  ;;  %v2832_v51 = vld [vmem:[#allocation7 + $0x20] sm:$0xff]  ;;  %v2834_v60 = vld [vmem:[#allocation7 + $0x28] sm:$0xff]  ;;  %3481 = vst [vmem:[#allocation36_spill] sm:$0xff] %v2850_v41  ;;  %869 = vmatpush.msrb.mxu2 %v2852_v38 }
 0x208   :  { %828 = vmatpush.msrb.mxu0 %v2832_v51  ;;  %848 = vmatpush.msrb.mxu1 %v2834_v60 }
 0x209   :  { %v1955_v42 = vmul.f32 -1.442695, %v668_v32  ;;  %v2842_v32 = vld [vmem:[#allocation7 + $0x38] sm:$0xff]  ;;  %1083 = vmatpush.msra.mxu2 %v2668_v4 }
 0x20a   :  { %v2028_v48 = vpop.eup %2027  ;;  %888 = vmatpush.msrb.mxu3 %v2842_v32  ;;  %829 = vmatpush.msrb.mxu0 %v2848_v47 }
 0x20b   :  { %v2030_v1 = vpop.eup %2029  ;;  %v2838_v33 = vadd.f32 1.0, %v2028_v48  ;;  %2031 = vpow2.f32 %v1955_v42  ;;  %849 = vmatpush.msrb.mxu1 %v2850_v41  ;;  %v2857_v42 = vld [vmem:[#allocation7 + $0x18] sm:$0xff]  ;;  %v642_v48 = vpop.f32.mrf.mxu2  ;;  %1084 = vmatpush.msra.mxu2 %v2680_v7 }
 0x20c   :  { %v2844_v39 = vadd.f32 1.0, %v2030_v1  ;;  %3482 = vst [vmem:[#allocation37_spill] sm:$0xff] %v2857_v42  ;;  %889 = vmatpush.msrb.mxu3 %v2857_v42  ;;  %1043 = vmatpush.msra.mxu0 %v2664_v54  ;;  %v519_v1 = vld [vmem:[#allocation4 + $0x50] sm:$0xff] }
 0x20d   :  { %2033 = vrcp.f32 %v2838_v33  ;;  %1063 = vmatpush.msra.mxu1 %v2666_v3  ;;  %v667_v42 = vadd.f32 %v642_v48, %v519_v1  ;;  %1085 = vmatpush.msra.mxu2 %v2692_v11  ;;  %v682_v11 = vand.u32 2147483647, %v2838_v33  ;;  %vm678_vm2 = vweird.f32 %v2838_v33 }
 0x20e   :  { %2035 = vrcp.f32 %v2844_v39  ;;  %1103 = vmatpush.msra.mxu3 %v2672_v62  ;;  %1044 = vmatpush.msra.mxu0 %v2676_v5  ;;  %vm697_vm4 = vweird.f32 %v2844_v39 }
 0x20f   :  { %1064 = vmatpush.msra.mxu1 %v2678_v6  ;;  %1086 = vmatpush.msra.mxu2 %v2704_v15  ;;  %vm683_vm5 = vcmp.eq.f32.partialorder %v682_v11, 8.507059e+37 }
 0x210   :  { %1104 = vmatpush.msra.mxu3 %v2684_v8  ;;  %1045 = vmatpush.msra.mxu0 %v2688_v9 }
 0x211   :  { %v2032_v47 = vpop.eup %2031  ;;  %1065 = vmatpush.msra.mxu1 %v2690_v10  ;;  %v684_v10 = vand.u32 2147483648, %v2838_v33  ;;  %1087 = vmatpush.msra.mxu2 %v2716_v19 }
 0x212   :  { %v2868_v41 = vadd.f32 1.0, %v2032_v47  ;;  %1105 = vmatpush.msra.mxu3 %v2696_v12  ;;  %1046 = vmatpush.msra.mxu0 %v2700_v13  ;;  %v703_v13 = vand.u32 2147483648, %v2844_v39 }
 0x213   :  { %v2034_v54 = vpop.eup %2033  ;;  %1066 = vmatpush.msra.mxu1 %v2702_v14  ;;  %1088 = vmatpush.msra.mxu2 %v2728_v23 }
 0x214   :  { %v2036_v4 = vpop.eup %2035  ;;  %v674_v62 = vmul.f32 %v2034_v54, %v2838_v33  ;;  %2037 = vrcp.f32 %v2868_v41  ;;  %1106 = vmatpush.msra.mxu3 %v2708_v16  ;;  %1047 = vmatpush.msra.mxu0 %v2712_v17  ;;  %vm679_vm0 = vweird.f32 %v2034_v54  ;;  %v704_v33 = vor.u32 1.1754944e-38, %v703_v13 }
 0x215   :  { %v693_v47 = vmul.f32 %v2036_v4, %v2844_v39  ;;  %2039 = vtanh.f32 %v667_v42  ;;  %1067 = vmatpush.msra.mxu1 %v2714_v18  ;;  %vm698_vm1 = vweird.f32 %v2036_v4  ;;  %vm680_vm3 = vmor %vm678_vm2, %vm679_vm0  ;;  %1089 = vmatpush.msra.mxu2 %v2740_v27  ;;  %vm717_vm10 = vweird.f32 %v2868_v41 }
 0x216   :  { %v675_v1 = vsub.f32 1.0, %v674_v62  ;;  %1107 = vmatpush.msra.mxu3 %v2720_v20  ;;  %1048 = vmatpush.msra.mxu0 %v2724_v21  ;;  %v685_v20 = vor.u32 1.1754944e-38, %v684_v10  ;;  %vm699_vm6 = vmor %vm697_vm4, %vm698_vm1 }
 0x217   :  { %v694_v48 = vsub.f32 1.0, %v693_v47  ;;  %v701_v47 = vand.u32 2147483647, %v2844_v39  ;;  %1068 = vmatpush.msra.mxu1 %v2726_v22  ;;  %1090 = vmatpush.msra.mxu2 %v2752_v31 }
 0x218   :  { %v676_v12 = vmul.f32 %v2034_v54, %v675_v1  ;;  %1108 = vmatpush.msra.mxu3 %v2732_v24  ;;  %1049 = vmatpush.msra.mxu0 %v2736_v25 }
 0x219   :  { %v695_v62 = vmul.f32 %v2036_v4, %v694_v48  ;;  %1069 = vmatpush.msra.mxu1 %v2738_v26  ;;  %vm702_vm7 = vcmp.eq.f32.partialorder %v701_v47, 8.507059e+37  ;;  %1091 = vmatpush.msra.mxu2 %v2764_v37 }
 0x21a   :  { %v2893_v42 = vpop.eup %2037  ;;  %v677_v1 = vadd.f32 %v2034_v54, %v676_v12  ;;  %1109 = vmatpush.msra.mxu3 %v2744_v28  ;;  %1050 = vmatpush.msra.mxu0 %v2748_v29 }
 0x21b   :  { %v713_v48 = vmul.f32 %v2893_v42, %v2868_v41  ;;  %v696_v19 = vadd.f32 %v2036_v4, %v695_v62  ;;  %v2040_v10 = vpop.eup %2039  ;;  %1070 = vmatpush.msra.mxu1 %v2750_v30  ;;  %vm718_vm9 = vweird.f32 %v2893_v42  ;;  %1092 = vmatpush.msra.mxu2 %v2776_v45 }
 0x21c   :  { %v681_v12 = vsel %vm680_vm3, %v2034_v54, %v677_v1  ;;  %1110 = vmatpush.msra.mxu3 %v2756_v34  ;;  %v738_v54 = vpop.permute.xlu1 %737  ;;  %1051 = vmatpush.msra.mxu0 %v2760_v35  ;;  %vm719_vm11 = vmor %vm717_vm10, %vm718_vm9 }
 0x21d   :  { %v686_v24 = vsel %vm683_vm5, %v685_v20, %v681_v12  ;;  %v714_v23 = vsub.f32 1.0, %v713_v48  ;;  %v700_v22 = vsel %vm699_vm6, %v2036_v4, %v696_v19  ;;  %1071 = vmatpush.msra.mxu1 %v2762_v36  ;;  %vm739_vm8 = vcmp.eq.s32.totalorder %v738_v54, 1  ;;  %1093 = vmatpush.msra.mxu2 %v2790_v52  ;;  %v3484_v48 = vld [vmem:[#allocation31_spill] sm:$0xff]  ;;  %v3485_v12 = vld [vmem:[#allocation32_spill] sm:$0xff]  ;;  %v3491_v54 = vld [vmem:[#allocation37_spill] sm:$0xff] }
 0x21e   :  { %v728_v39 = vmul.f32 %v2040_v10, %v686_v24  ;;  %v705_v62 = vsel %vm702_vm7, %v704_v33, %v700_v22  ;;  %1111 = vmatpush.msra.mxu3 %v2768_v40  ;;  %1052 = vmatpush.msra.mxu0 %v2772_v43  ;;  %v723_v20 = vand.u32 2147483648, %v2868_v41  ;;  %v3486_v33 = vld [vmem:[#allocation33_spill] sm:$0xff]  ;;  %v3487_v10 = vld [vmem:[#allocation34_spill] sm:$0xff] }
 0x21f   :  { %v715_v11 = vmul.f32 %v2893_v42, %v714_v23  ;;  %v727_v13 = vmul.f32 %v705_v62, %v2653_v56  ;;  %1072 = vmatpush.msra.mxu1 %v2774_v44  ;;  %v721_v23 = vand.u32 2147483647, %v2868_v41  ;;  %1094 = vmatpush.msra.mxu2 %v2800_v58  ;;  %v3483_v41 = vld [vmem:[#allocation30_spill] sm:$0xff] }
 0x220   :  { %1112 = vmatpush.msra.mxu3 %v2780_v46  ;;  %1053 = vmatpush.msra.mxu0 %v2784_v49  ;;  %v724_v24 = vor.u32 1.1754944e-38, %v723_v20  ;;  %v3493_v20 = vld [vmem:[#allocation21_spill] sm:$0xff] }
 0x221   :  { %v729_v4 = vadd.f32 %v728_v39, %v727_v13  ;;  %v716_v19 = vadd.f32 %v2893_v42, %v715_v11  ;;  %1073 = vmatpush.msra.mxu1 %v2786_v50  ;;  %vm722_vm12 = vcmp.eq.f32.partialorder %v721_v23, 8.507059e+37  ;;  %1095 = vmatpush.msra.mxu2 %v2812_v2  ;;  %v3488_v39 = vld [vmem:[#allocation18_spill] sm:$0xff]  ;;  %v3489_v13 = vld [vmem:[#allocation35_spill] sm:$0xff]  ;;  %v3494_v23 = vld [vmem:[#allocation17_spill] sm:$0xff] }
 0x222   :  { %1113 = vmatpush.msra.mxu3 %v2792_v53  ;;  %1054 = vmatpush.msra.mxu0 %v2796_v55 }
 0x223   :  { %2041 = vtanh.f32 %v729_v4  ;;  %v2926_v22 = vsel %vm739_vm8, %v729_v4, %v2653_v56  ;;  %1074 = vmatpush.msra.mxu1 %v2798_v57  ;;  %v720_v56 = vsel %vm719_vm11, %v2893_v42, %v716_v19  ;;  %1096 = vmatpush.msra.mxu2 %v3486_v33  ;;  %v3490_v4 = vld [vmem:[#allocation36_spill] sm:$0xff] }
 0x224   :  { %1114 = vmatpush.msra.mxu3 %v2804_v59  ;;  %1055 = vmatpush.msra.mxu0 %v2808_v63  ;;  %v725_v1 = vsel %vm722_vm12, %v724_v24, %v720_v56  ;;  %v3492_v19 = vld [vmem:[#allocation20_spill] sm:$0xff]  ;;  %v3495_v56 = vld [vmem:[#allocation19_spill] sm:$0xff]  ;;  %v3496_v24 = vld [vmem:[#allocation22_spill] sm:$0xff] }
 0x225   :  { %1075 = vmatpush.msra.mxu1 %v2810_v61  ;;  %1097 = vmatpush.msra.mxu2 %v2836_v0 }
 0x226   :  { %1115 = vmatpush.msra.mxu3 %v3483_v41  ;;  %1056 = vmatpush.msra.mxu0 %v3484_v48 }
 0x227   :  { %1076 = vmatpush.msra.mxu1 %v3485_v12  ;;  %1098 = vmatpush.msra.mxu2 %v2852_v38 }
 0x228   :  { %1116 = vmatpush.msra.mxu3 %v3487_v10  ;;  %1057 = vmatpush.msra.mxu0 %v2832_v51 }
 0x229   :  { %v2042_v47 = vpop.eup %2041  ;;  %1077 = vmatpush.msra.mxu1 %v2834_v60 }
 0x22a   :  { %v731_v42 = vmul.f32 %v2042_v47, %v725_v1  ;;  %1117 = vmatpush.msra.mxu3 %v2842_v32  ;;  %1058 = vmatpush.msra.mxu0 %v3489_v13  ;;  %v3497_v47 = vld [vmem:[#allocation23_spill] sm:$0xff] }
 0x22b   :  { %1078 = vmatpush.msra.mxu1 %v3490_v4 }
 0x22c   :  { %v2951_v62 = vsel %vm739_vm8, %v731_v42, %v3488_v39  ;;  %v742_v11 = vsel %vm739_vm8, %v731_v42, 0.0  ;;  %1118 = vmatpush.msra.mxu3 %v3491_v54 }
 0x22d   :  { %744 = vst [vmem:[#allocation9 + $0x10] sm:$0xff] %v742_v11  ;;  %830 = vmatmul.f32.vlgmr.msrb.gmra.mxu0 %v2951_v62  ;;  %850 = vmatmul.f32.vlgmr.msrb.gmra.mxu1 %v2951_v62 }
 0x22e   :  { %870 = vmatmul.f32.vlgmr.msrb.gmra.mxu2 %v2951_v62  ;;  %890 = vmatmul.f32.vlgmr.msrb.gmra.mxu3 %v2951_v62 }
 0x22f   :  { %1272 = vmatpush.msrb.mxu0 %v3492_v19  ;;  %1292 = vmatpush.msrb.mxu1 %v2666_v3  ;;  %v3498_v3 = vld [vmem:[#allocation24_spill] sm:$0xff] }
 0x230   :  { %1312 = vmatpush.msrb.mxu2 %v3493_v20  ;;  %1332 = vmatpush.msrb.mxu3 %v3494_v23  ;;  %v967_v23 = vpop.permute.xlu1 %966 }
 0x231   :  { %1273 = vmatpush.msrb.mxu0 %v2676_v5  ;;  %1293 = vmatpush.msrb.mxu1 %v2678_v6  ;;  %v3499_v5 = vld [vmem:[#allocation25_spill] sm:$0xff]  ;;  %v3500_v6 = vld [vmem:[#allocation26_spill] sm:$0xff]  ;;  %vm968_vm7 = vcmp.eq.s32.totalorder %v967_v23, 1 }
 0x232   :  { %1313 = vmatpush.msrb.mxu2 %v2680_v7  ;;  %1333 = vmatpush.msrb.mxu3 %v2684_v8  ;;  %v3501_v7 = vld [vmem:[#allocation27_spill] sm:$0xff]  ;;  %v3502_v8 = vld [vmem:[#allocation28_spill] sm:$0xff] }
 0x233   :  { %1274 = vmatpush.msrb.mxu0 %v2688_v9  ;;  %1294 = vmatpush.msrb.mxu1 %v3495_v56  ;;  %v3503_v9 = vld [vmem:[#allocation29_spill] sm:$0xff] }
 0x234   :  { %1314 = vmatpush.msrb.mxu2 %v3496_v24  ;;  %1334 = vmatpush.msrb.mxu3 %v3497_v47 }
 0x235   :  { %1275 = vmatpush.msrb.mxu0 %v3498_v3  ;;  %1295 = vmatpush.msrb.mxu1 %v2702_v14  ;;  %v746_v14 = vld [vmem:[#allocation4 + $0x60] sm:$0xff] }
 0x236   :  { %1315 = vmatpush.msrb.mxu2 %v2704_v15  ;;  %1335 = vmatpush.msrb.mxu3 %v2708_v16  ;;  %v747_v15 = vld [vmem:[#allocation4 + $0x68] sm:$0xff] }
 0x237   :  { %1276 = vmatpush.msrb.mxu0 %v2712_v17  ;;  %1296 = vmatpush.msrb.mxu1 %v2714_v18 }
 0x238   :  { %1316 = vmatpush.msrb.mxu2 %v3499_v5  ;;  %1336 = vmatpush.msrb.mxu3 %v3500_v6 }
 0x239   :  { %1277 = vmatpush.msrb.mxu0 %v2724_v21  ;;  %1297 = vmatpush.msrb.mxu1 %v3501_v7 }
 0x23a   :  { %1317 = vmatpush.msrb.mxu2 %v3502_v8  ;;  %1337 = vmatpush.msrb.mxu3 %v3503_v9 }
 0x23b   :  { %1278 = vmatpush.msrb.mxu0 %v2736_v25  ;;  %1298 = vmatpush.msrb.mxu1 %v2738_v26 }
 0x23c   :  { %1318 = vmatpush.msrb.mxu2 %v2740_v27  ;;  %1338 = vmatpush.msrb.mxu3 %v2744_v28 }
 0x23d   :  { %1279 = vmatpush.msrb.mxu0 %v2748_v29  ;;  %1299 = vmatpush.msrb.mxu1 %v2750_v30 }
 0x23e   :  { %1319 = vmatpush.msrb.mxu2 %v2752_v31  ;;  %1339 = vmatpush.msrb.mxu3 %v2756_v34 }
 0x23f   :  { %1280 = vmatpush.msrb.mxu0 %v2760_v35  ;;  %1300 = vmatpush.msrb.mxu1 %v2762_v36  ;;  %v2123_v36 = vld [vmem:[%s3394_s1] sm:$0xff]  ;;  %s2258_s1 = smov [#allocation9]  }
 0x240   :  { %1320 = vmatpush.msrb.mxu2 %v2764_v37  ;;  %1340 = vmatpush.msrb.mxu3 %v2768_v40  ;;  %vm1964_vm13 = vcmp.gt.s32.totalorder %v2123_v36, 4  ;;  %v748_v37 = vld [vmem:[#allocation4 + $0x70] sm:$0xff]  ;;  %vm1968_vm14 = vcmp.gt.s32.totalorder %v2123_v36, 5  ;;  %s3378_s7 = sshll.u32 %s2258_s1, 4  ;;  %s1899_s7 = int_to_ptr.vmem [resolvable:$true] %s3378_s7 }
 0x241   :  { %1281 = vmatpush.msrb.mxu0 %v2772_v43  ;;  %1301 = vmatpush.msrb.mxu1 %v2774_v44  ;;  %v3504_v43 = vmov 0  }
 0x242   :  { %1321 = vmatpush.msrb.mxu2 %v2776_v45  ;;  %1341 = vmatpush.msrb.mxu3 %v2780_v46  ;;  %v1193_v44 = vsel %vm1964_vm13, 1, %v3504_v43 }
 0x243   :  { %1282 = vmatpush.msrb.mxu0 %v2784_v49  ;;  %1302 = vmatpush.msrb.mxu1 %v2786_v50 }
 0x244   :  { %1322 = vmatpush.msrb.mxu2 %v2790_v52  ;;  %1342 = vmatpush.msrb.mxu3 %v2792_v53 }
 0x245   :  { %1283 = vmatpush.msrb.mxu0 %v2796_v55  ;;  %1303 = vmatpush.msrb.mxu1 %v2798_v57 }
 0x246   :  { %1323 = vmatpush.msrb.mxu2 %v2800_v58  ;;  %1343 = vmatpush.msrb.mxu3 %v2804_v59  ;;  %v1422_v58 = vsel %vm1968_vm14, 1, %v3504_v43 }
 0x247   :  { %1284 = vmatpush.msrb.mxu0 %v2808_v63  ;;  %1304 = vmatpush.msrb.mxu1 %v2810_v61 }
 0x248   :  { %1324 = vmatpush.msrb.mxu2 %v2812_v2  ;;  %1344 = vmatpush.msrb.mxu3 %v3483_v41 }
 0x249   :  { %1285 = vmatpush.msrb.mxu0 %v3484_v48  ;;  %1305 = vmatpush.msrb.mxu1 %v3485_v12 }
 0x24a   :  { %1325 = vmatpush.msrb.mxu2 %v3486_v33  ;;  %1345 = vmatpush.msrb.mxu3 %v3487_v10 }
 0x24b   :  { %1286 = vmatpush.msrb.mxu0 %v2832_v51  ;;  %1306 = vmatpush.msrb.mxu1 %v2834_v60 }
 0x24c   :  { %1326 = vmatpush.msrb.mxu2 %v2836_v0  ;;  %1346 = vmatpush.msrb.mxu3 %v2842_v32  ;;  %v749_v0 = vld [vmem:[#allocation4 + $0x78] sm:$0xff] }
 0x24d   :  { %1287 = vmatpush.msrb.mxu0 %v3489_v13  ;;  %1307 = vmatpush.msrb.mxu1 %v3490_v4 }
 0x24e   :  { %1327 = vmatpush.msrb.mxu2 %v2852_v38  ;;  %1347 = vmatpush.msrb.mxu3 %v3491_v54 }
 0x24f   :  { %1195 = vperm.xlu2 %1994, %v1193_v44  }
 0x257   :  { %1424 = vperm.xlu2 %1994, %v1422_v58  }
 0x2aa   :  { %v831_v16 = vpop.f32.mrf.mxu0  ;;  %v851_v17 = vpop.f32.mrf.mxu1 }
 0x2ab   :  { %v894_v18 = vadd.f32 %v831_v16, %v746_v14  ;;  %v895_v21 = vadd.f32 %v851_v17, %v747_v15  ;;  %v976_v17 = vld [vmem:[#allocation4 + $0x88] sm:$0xff] }
 0x2ad   :  { %v1957_v25 = vmul.f32 -1.442695, %v894_v18  ;;  %v1958_v26 = vmul.f32 -1.442695, %v895_v21 }
 0x2af   :  { %2043 = vpow2.f32 %v1957_v25 }
 0x2b0   :  { %2045 = vpow2.f32 %v1958_v26 }
 0x2b1   :  { %v891_v27 = vpop.f32.mrf.mxu3  ;;  %v871_v40 = vpop.f32.mrf.mxu2 }
 0x2b2   :  { %v897_v28 = vadd.f32 %v891_v27, %v749_v0  ;;  %v896_v50 = vadd.f32 %v871_v40, %v748_v37  ;;  %v978_v27 = vld [vmem:[#allocation4 + $0x98] sm:$0xff]  ;;  %v977_v37 = vld [vmem:[#allocation4 + $0x90] sm:$0xff] }
 0x2b4   :  { %v1959_v29 = vmul.f32 -1.442695, %v897_v28 }
 0x2b5   :  { %v2044_v30 = vpop.eup %2043 }
 0x2b6   :  { %v2046_v31 = vpop.eup %2045  ;;  %v901_v34 = vadd.f32 1.0, %v2044_v30  ;;  %2047 = vpow2.f32 %v1959_v29 }
 0x2b7   :  { %v920_v35 = vadd.f32 1.0, %v2046_v31 }
 0x2b8   :  { %2049 = vrcp.f32 %v901_v34  ;;  %v913_v63 = vand.u32 2147483648, %v901_v34  ;;  %v911_v38 = vand.u32 2147483647, %v901_v34  ;;  %vm907_vm1 = vweird.f32 %v901_v34 }
 0x2b9   :  { %2051 = vrcp.f32 %v920_v35  ;;  %v932_v61 = vand.u32 2147483648, %v920_v35  ;;  %v930_v60 = vand.u32 2147483647, %v920_v35  ;;  %vm926_vm2 = vweird.f32 %v920_v35 }
 0x2ba   :  { %v914_v1 = vor.u32 1.1754944e-38, %v913_v63  ;;  %vm912_vm5 = vcmp.eq.f32.partialorder %v911_v38, 8.507059e+37 }
 0x2bb   :  { %v933_v42 = vor.u32 1.1754944e-38, %v932_v61  ;;  %vm931_vm6 = vcmp.eq.f32.partialorder %v930_v60, 8.507059e+37 }
 0x2bc   :  { %v2048_v45 = vpop.eup %2047 }
 0x2bd   :  { %v940_v46 = vadd.f32 1.0, %v2048_v45 }
 0x2be   :  { %v2050_v49 = vpop.eup %2049 }
 0x2bf   :  { %v2052_v52 = vpop.eup %2051  ;;  %v903_v53 = vmul.f32 %v2050_v49, %v901_v34  ;;  %2053 = vrcp.f32 %v940_v46  ;;  %vm908_vm15 = vweird.f32 %v2050_v49  ;;  %v952_v47 = vand.u32 2147483648, %v940_v46 }
 0x2c0   :  { %v922_v55 = vmul.f32 %v2052_v52, %v920_v35  ;;  %2055 = vtanh.f32 %v896_v50  ;;  %vm927_vm0 = vweird.f32 %v2052_v52  ;;  %vm909_vm3 = vmor %vm907_vm1, %vm908_vm15  ;;  %vm946_vm9 = vweird.f32 %v940_v46 }
 0x2c1   :  { %v904_v57 = vsub.f32 1.0, %v903_v53  ;;  %vm928_vm4 = vmor %vm926_vm2, %vm927_vm0  ;;  %v950_v5 = vand.u32 2147483647, %v940_v46  ;;  %v953_v7 = vor.u32 1.1754944e-38, %v952_v47 }
 0x2c2   :  { %v923_v59 = vsub.f32 1.0, %v922_v55 }
 0x2c3   :  { %v905_v2 = vmul.f32 %v2050_v49, %v904_v57  ;;  %vm951_vm11 = vcmp.eq.f32.partialorder %v950_v5, 8.507059e+37 }
 0x2c4   :  { %v924_v51 = vmul.f32 %v2052_v52, %v923_v59 }
 0x2c5   :  { %v2054_v32 = vpop.eup %2053  ;;  %v906_v41 = vadd.f32 %v2050_v49, %v905_v2 }
 0x2c6   :  { %v925_v48 = vadd.f32 %v2052_v52, %v924_v51  ;;  %v942_v12 = vmul.f32 %v2054_v32, %v940_v46  ;;  %v2056_v10 = vpop.eup %2055  ;;  %vm947_vm8 = vweird.f32 %v2054_v32 }
 0x2c7   :  { %v910_v33 = vsel %vm909_vm3, %v2050_v49, %v906_v41  ;;  %vm948_vm10 = vmor %vm946_vm9, %vm947_vm8 }
 0x2c8   :  { %v915_v39 = vsel %vm912_vm5, %v914_v1, %v910_v33  ;;  %v929_v11 = vsel %vm928_vm4, %v2052_v52, %v925_v48  ;;  %v943_v13 = vsub.f32 1.0, %v942_v12 }
 0x2c9   :  { %v934_v4 = vsel %vm931_vm6, %v933_v42, %v929_v11  ;;  %v957_v54 = vmul.f32 %v2056_v10, %v915_v39  ;;  %v1196_v10 = vpop.permute.xlu2 %1195 }
 0x2ca   :  { %v956_v19 = vmul.f32 %v934_v4, %v2926_v22  ;;  %v944_v20 = vmul.f32 %v2054_v32, %v943_v13  ;;  %vm1197_vm4 = vcmp.eq.s32.totalorder %v1196_v10, 1 }
 0x2cc   :  { %v958_v56 = vadd.f32 %v957_v54, %v956_v19  ;;  %v945_v24 = vadd.f32 %v2054_v32, %v944_v20 }
 0x2ce   :  { %2057 = vtanh.f32 %v958_v56  ;;  %v3036_v3 = vsel %vm968_vm7, %v958_v56, %v2926_v22  ;;  %v949_v6 = vsel %vm948_vm10, %v2054_v32, %v945_v24  ;;  %v975_v22 = vld [vmem:[#allocation4 + $0x80] sm:$0xff] }
 0x2cf   :  { %v954_v9 = vsel %vm951_vm11, %v953_v7, %v949_v6 }
 0x2d4   :  { %v2058_v8 = vpop.eup %2057 }
 0x2d5   :  { %v960_v14 = vmul.f32 %v2058_v8, %v954_v9 }
 0x2d7   :  { %v3040_v15 = vsel %vm968_vm7, %v960_v14, %v2951_v62  ;;  %v971_v16 = vsel %vm968_vm7, %v960_v14, 0.0 }
 0x2d8   :  { %973 = vst [vmem:[#allocation9 + $0x18] sm:$0xff] %v971_v16  ;;  %1059 = vmatmul.f32.vlgmr.msra.gmra.mxu0 %v3040_v15  ;;  %1079 = vmatmul.f32.vlgmr.msra.gmra.mxu1 %v3040_v15  ;;  %v3063_v16 = vld [vmem:[#allocation7 + $0x1e8] sm:$0xff] }
 0x2d9   :  { %1099 = vmatmul.f32.vlgmr.msra.gmra.mxu2 %v3040_v15  ;;  %1119 = vmatmul.f32.vlgmr.msra.gmra.mxu3 %v3040_v15 }
 0x2da   :  { %1521 = vmatpush.msra.mxu1 %v3063_v16 }
 0x355   :  { %v1060_v18 = vpop.f32.mrf.mxu0  ;;  %v1080_v21 = vpop.f32.mrf.mxu1 }
 0x356   :  { %v1123_v25 = vadd.f32 %v1060_v18, %v975_v22  ;;  %v1124_v26 = vadd.f32 %v1080_v21, %v976_v17  ;;  %v3065_v22 = vld [vmem:[#allocation7 + $0x1f0] sm:$0xff]  ;;  %v3073_v17 = vld [vmem:[#allocation7 + $0x1c0] sm:$0xff]  ;;  %v3075_v18 = vld [vmem:[#allocation7 + $0x1c8] sm:$0xff] }
 0x357   :  { %1541 = vmatpush.msra.mxu2 %v3065_v22  ;;  %v3077_v21 = vld [vmem:[#allocation7 + $0x1d0] sm:$0xff]  ;;  %1522 = vmatpush.msra.mxu1 %v3075_v18 }
 0x358   :  { %v1961_v0 = vmul.f32 -1.442695, %v1123_v25  ;;  %v1962_v62 = vmul.f32 -1.442695, %v1124_v26  ;;  %v3081_v25 = vld [vmem:[#allocation7 + $0x1d8] sm:$0xff]  ;;  %v3085_v26 = vld [vmem:[#allocation7 + $0x1a0] sm:$0xff] }
 0x359   :  { %1542 = vmatpush.msra.mxu2 %v3077_v21 }
 0x35a   :  { %2059 = vpow2.f32 %v1961_v0  ;;  %v3087_v0 = vld [vmem:[#allocation7 + $0x1a8] sm:$0xff] }
 0x35b   :  { %2061 = vpow2.f32 %v1962_v62  ;;  %v3089_v62 = vld [vmem:[#allocation7 + $0x1b0] sm:$0xff]  ;;  %1523 = vmatpush.msra.mxu1 %v3087_v0 }
 0x35c   :  { %v1120_v28 = vpop.f32.mrf.mxu3  ;;  %v1100_v40 = vpop.f32.mrf.mxu2  ;;  %1543 = vmatpush.msra.mxu2 %v3089_v62 }
 0x35d   :  { %v1126_v29 = vadd.f32 %v1120_v28, %v978_v27  ;;  %v1125_v46 = vadd.f32 %v1100_v40, %v977_v37  ;;  %v3093_v27 = vld [vmem:[#allocation7 + $0x1b8] sm:$0xff]  ;;  %v3097_v28 = vld [vmem:[#allocation7 + $0x180] sm:$0xff] }
 0x35e   :  { %v3117_v37 = vld [vmem:[#allocation7 + $0x178] sm:$0xff]  ;;  %v3121_v40 = vld [vmem:[#allocation7 + $0x140] sm:$0xff] }
 0x35f   :  { %v1963_v30 = vmul.f32 -1.442695, %v1126_v29  ;;  %v3099_v29 = vld [vmem:[#allocation7 + $0x188] sm:$0xff] }
 0x360   :  { %v2060_v31 = vpop.eup %2059  ;;  %1524 = vmatpush.msra.mxu1 %v3099_v29 }
 0x361   :  { %v2062_v34 = vpop.eup %2061  ;;  %v1130_v35 = vadd.f32 1.0, %v2060_v31  ;;  %2063 = vpow2.f32 %v1963_v30  ;;  %v3101_v30 = vld [vmem:[#allocation7 + $0x190] sm:$0xff]  ;;  %v3105_v31 = vld [vmem:[#allocation7 + $0x198] sm:$0xff] }
 0x362   :  { %v1149_v36 = vadd.f32 1.0, %v2062_v34  ;;  %1544 = vmatpush.msra.mxu2 %v3101_v30  ;;  %v3109_v34 = vld [vmem:[#allocation7 + $0x160] sm:$0xff] }
 0x363   :  { %2065 = vrcp.f32 %v1130_v35  ;;  %v1142_v57 = vand.u32 2147483648, %v1130_v35  ;;  %v1140_v59 = vand.u32 2147483647, %v1130_v35  ;;  %vm1136_vm14 = vweird.f32 %v1130_v35 }
 0x364   :  { %2067 = vrcp.f32 %v1149_v36  ;;  %v1161_v63 = vand.u32 2147483648, %v1149_v36  ;;  %v1159_v2 = vand.u32 2147483647, %v1149_v36  ;;  %vm1155_vm0 = vweird.f32 %v1149_v36 }
 0x365   :  { %v1143_v60 = vor.u32 1.1754944e-38, %v1142_v57  ;;  %vm1141_vm1 = vcmp.eq.f32.partialorder %v1140_v59, 8.507059e+37  ;;  %v3149_v57 = vld [vmem:[#allocation7 + $0x110] sm:$0xff]  ;;  %v1205_v59 = vld [vmem:[#allocation4 + $0xa8] sm:$0xff] }
 0x366   :  { %v1162_v48 = vor.u32 1.1754944e-38, %v1161_v63  ;;  %vm1160_vm3 = vcmp.eq.f32.partialorder %v1159_v2, 8.507059e+37  ;;  %v3153_v63 = vld [vmem:[#allocation7 + $0x118] sm:$0xff]  ;;  %v3159_v2 = vld [vmem:[#allocation7 + $0xe8] sm:$0xff] }
 0x367   :  { %v2064_v43 = vpop.eup %2063 }
 0x368   :  { %v1169_v44 = vadd.f32 1.0, %v2064_v43  ;;  %v3123_v43 = vld [vmem:[#allocation7 + $0x148] sm:$0xff] }
 0x369   :  { %v2066_v45 = vpop.eup %2065 }
 0x36a   :  { %v2068_v49 = vpop.eup %2067  ;;  %v1132_v50 = vmul.f32 %v2066_v45, %v1130_v35  ;;  %2069 = vrcp.f32 %v1169_v44  ;;  %vm1137_vm12 = vweird.f32 %v2066_v45  ;;  %v1181_v23 = vand.u32 2147483648, %v1169_v44  ;;  %v3111_v35 = vld [vmem:[#allocation7 + $0x168] sm:$0xff] }
 0x36b   :  { %v1151_v52 = vmul.f32 %v2068_v49, %v1149_v36  ;;  %2071 = vtanh.f32 %v1125_v46  ;;  %vm1156_vm13 = vweird.f32 %v2068_v49  ;;  %vm1138_vm15 = vmor %vm1136_vm14, %vm1137_vm12  ;;  %vm1175_vm6 = vweird.f32 %v1169_v44  ;;  %v3113_v36 = vld [vmem:[#allocation7 + $0x170] sm:$0xff]  ;;  %1525 = vmatpush.msra.mxu1 %v3111_v35  ;;  %v3133_v46 = vld [vmem:[#allocation7 + $0x120] sm:$0xff] }
 0x36c   :  { %v1133_v53 = vsub.f32 1.0, %v1132_v50  ;;  %vm1157_vm2 = vmor %vm1155_vm0, %vm1156_vm13  ;;  %v1179_v24 = vand.u32 2147483647, %v1169_v44  ;;  %v1182_v5 = vor.u32 1.1754944e-38, %v1181_v23  ;;  %1545 = vmatpush.msra.mxu2 %v3113_v36  ;;  %v3137_v50 = vld [vmem:[#allocation7 + $0x130] sm:$0xff]  ;;  %v3195_v23 = vld [vmem:[#allocation7 + $0x88] sm:$0xff] }
 0x36d   :  { %v1152_v55 = vsub.f32 1.0, %v1151_v52  ;;  %1526 = vmatpush.msra.mxu1 %v3123_v43  ;;  %v3141_v52 = vld [vmem:[#allocation7 + $0x138] sm:$0xff] }
 0x36e   :  { %v1134_v58 = vmul.f32 %v2066_v45, %v1133_v53  ;;  %vm1180_vm8 = vcmp.eq.f32.partialorder %v1179_v24, 8.507059e+37  ;;  %v3145_v53 = vld [vmem:[#allocation7 + $0x100] sm:$0xff]  ;;  %v3197_v24 = vld [vmem:[#allocation7 + $0x90] sm:$0xff] }
 0x36f   :  { %v1153_v61 = vmul.f32 %v2068_v49, %v1152_v55  ;;  %v3147_v55 = vld [vmem:[#allocation7 + $0x108] sm:$0xff] }
 0x370   :  { %v2070_v38 = vpop.eup %2069  ;;  %v1135_v51 = vadd.f32 %v2066_v45, %v1134_v58  ;;  %v1204_v58 = vld [vmem:[#allocation4 + $0xa0] sm:$0xff] }
 0x371   :  { %v1171_v32 = vmul.f32 %v2070_v38, %v1169_v44  ;;  %v1154_v41 = vadd.f32 %v2068_v49, %v1153_v61  ;;  %v2072_v12 = vpop.eup %2071  ;;  %vm1176_vm5 = vweird.f32 %v2070_v38  ;;  %v3125_v44 = vld [vmem:[#allocation7 + $0x150] sm:$0xff]  ;;  %v3157_v61 = vld [vmem:[#allocation7 + $0xe0] sm:$0xff] }
 0x372   :  { %v1139_v1 = vsel %vm1138_vm15, %v2066_v45, %v1135_v51  ;;  %vm1177_vm7 = vmor %vm1175_vm6, %vm1176_vm5  ;;  %v3129_v45 = vld [vmem:[#allocation7 + $0x158] sm:$0xff]  ;;  %1546 = vmatpush.msra.mxu2 %v3125_v44 }
 0x373   :  { %v1144_v42 = vsel %vm1141_vm1, %v1143_v60, %v1139_v1  ;;  %v1172_v33 = vsub.f32 1.0, %v1171_v32  ;;  %v1158_v39 = vsel %vm1157_vm2, %v2068_v49, %v1154_v41  ;;  %v3135_v49 = vld [vmem:[#allocation7 + $0x128] sm:$0xff]  ;;  %v3165_v32 = vld [vmem:[#allocation7 + $0xf8] sm:$0xff] }
 0x374   :  { %v1186_v11 = vmul.f32 %v2072_v12, %v1144_v42  ;;  %v1163_v13 = vsel %vm1160_vm3, %v1162_v48, %v1158_v39  ;;  %1527 = vmatpush.msra.mxu1 %v3135_v49  ;;  %1547 = vmatpush.msra.mxu2 %v3137_v50  ;;  %v3169_v48 = vld [vmem:[#allocation7 + $0xc0] sm:$0xff]  ;;  %v3171_v12 = vld [vmem:[#allocation7 + $0xc8] sm:$0xff]  ;;  %v3173_v42 = vld [vmem:[#allocation7 + $0xd0] sm:$0xff] }
 0x375   :  { %v1173_v4 = vmul.f32 %v2070_v38, %v1172_v33  ;;  %v1185_v54 = vmul.f32 %v1163_v13, %v3036_v3  ;;  %v3177_v33 = vld [vmem:[#allocation7 + $0xd8] sm:$0xff]  ;;  %v3181_v13 = vld [vmem:[#allocation7 + $0xa0] sm:$0xff] }
 0x376   :  { %1528 = vmatpush.msra.mxu1 %v3147_v55  ;;  %1548 = vmatpush.msra.mxu2 %v3149_v57 }
 0x377   :  { %v1187_v19 = vadd.f32 %v1186_v11, %v1185_v54  ;;  %v1174_v20 = vadd.f32 %v2070_v38, %v1173_v4  ;;  %v1207_v11 = vld [vmem:[#allocation4 + $0xb8] sm:$0xff]  ;;  %v3183_v4 = vld [vmem:[#allocation7 + $0xa8] sm:$0xff]  ;;  %v3187_v54 = vld [vmem:[#allocation7 + $0xb0] sm:$0xff] }
 0x378   :  { %1529 = vmatpush.msra.mxu1 %v3159_v2 }
 0x379   :  { %2073 = vtanh.f32 %v1187_v19  ;;  %v3050_v56 = vsel %vm1197_vm4, %v1187_v19, %v3036_v3  ;;  %v1178_v47 = vsel %vm1177_vm7, %v2070_v38, %v1174_v20  ;;  %v3061_v3 = vld [vmem:[#allocation7 + $0x1e0] sm:$0xff]  ;;  %v3161_v38 = vld [vmem:[#allocation7 + $0xf0] sm:$0xff]  ;;  %v3189_v19 = vld [vmem:[#allocation7 + $0xb8] sm:$0xff] }
 0x37a   :  { %v1183_v7 = vsel %vm1180_vm8, %v1182_v5, %v1178_v47  ;;  %1501 = vmatpush.msra.mxu0 %v3061_v3  ;;  %1549 = vmatpush.msra.mxu2 %v3161_v38  ;;  %v3191_v20 = vld [vmem:[#allocation7 + $0x80] sm:$0xff]  ;;  %v3199_v47 = vld [vmem:[#allocation7 + $0x98] sm:$0xff] }
 0x37b   :  { %1530 = vmatpush.msra.mxu1 %v3171_v12  ;;  %v3203_v5 = vld [vmem:[#allocation7 + $0x60] sm:$0xff] }
 0x37c   :  { %1502 = vmatpush.msra.mxu0 %v3073_v17  ;;  %1550 = vmatpush.msra.mxu2 %v3173_v42  ;;  %3506 = vst [vmem:[#allocation31_spill] sm:$0xff] %v3203_v5 }
 0x37d   :  { %1531 = vmatpush.msra.mxu1 %v3183_v4 }
 0x37e   :  { %1503 = vmatpush.msra.mxu0 %v3085_v26  ;;  %1551 = vmatpush.msra.mxu2 %v3187_v54 }
 0x37f   :  { %v2074_v6 = vpop.eup %2073  ;;  %1532 = vmatpush.msra.mxu1 %v3195_v23 }
 0x380   :  { %v1189_v8 = vmul.f32 %v2074_v6, %v1183_v7  ;;  %1504 = vmatpush.msra.mxu0 %v3097_v28  ;;  %v3205_v6 = vld [vmem:[#allocation7 + $0x68] sm:$0xff]  ;;  %v3207_v7 = vld [vmem:[#allocation7 + $0x70] sm:$0xff]  ;;  %1552 = vmatpush.msra.mxu2 %v3197_v24 }
 0x381   :  { %3507 = vst [vmem:[#allocation32_spill] sm:$0xff] %v3205_v6  ;;  %1533 = vmatpush.msra.mxu1 %v3205_v6 }
 0x382   :  { %v3054_v9 = vsel %vm1197_vm4, %v1189_v8, %v3040_v15  ;;  %v1200_v14 = vsel %vm1197_vm4, %v1189_v8, 0.0  ;;  %v3069_v15 = vld [vmem:[#allocation7 + $0x1f8] sm:$0xff]  ;;  %1505 = vmatpush.msra.mxu0 %v3109_v34  ;;  %3508 = vst [vmem:[#allocation33_spill] sm:$0xff] %v3207_v7  ;;  %1553 = vmatpush.msra.mxu2 %v3207_v7  ;;  %v3237_v7 = vld [vmem:[#allocation7] sm:$0xff] }
 0x383   :  { %3505 = vst [vmem:[#allocation30_spill] sm:$0xff] %v3054_v9  ;;  %1288 = vmatmul.f32.vlgmr.msrb.gmra.mxu0 %v3054_v9  ;;  %1308 = vmatmul.f32.vlgmr.msrb.gmra.mxu1 %v3054_v9 }
 0x384   :  { %1202 = vst [vmem:[#allocation9 + $0x20] sm:$0xff] %v1200_v14  ;;  %1328 = vmatmul.f32.vlgmr.msrb.gmra.mxu2 %v3054_v9  ;;  %1348 = vmatmul.f32.vlgmr.msrb.gmra.mxu3 %v3054_v9  ;;  %v3211_v14 = vld [vmem:[#allocation7 + $0x78] sm:$0xff] }
 0x385   :  { %1561 = vmatpush.msra.mxu3 %v3069_v15  ;;  %1506 = vmatpush.msra.mxu0 %v3121_v40  ;;  %3509 = vst [vmem:[#allocation34_spill] sm:$0xff] %v3211_v14 }
 0x387   :  { %1562 = vmatpush.msra.mxu3 %v3081_v25  ;;  %1507 = vmatpush.msra.mxu0 %v3133_v46 }
 0x389   :  { %1563 = vmatpush.msra.mxu3 %v3093_v27  ;;  %1508 = vmatpush.msra.mxu0 %v3145_v53 }
 0x38b   :  { %1564 = vmatpush.msra.mxu3 %v3105_v31  ;;  %1509 = vmatpush.msra.mxu0 %v3157_v61 }
 0x38d   :  { %1565 = vmatpush.msra.mxu3 %v3117_v37  ;;  %1510 = vmatpush.msra.mxu0 %v3169_v48 }
 0x38f   :  { %1566 = vmatpush.msra.mxu3 %v3129_v45  ;;  %1511 = vmatpush.msra.mxu0 %v3181_v13 }
 0x391   :  { %1567 = vmatpush.msra.mxu3 %v3141_v52  ;;  %1512 = vmatpush.msra.mxu0 %v3191_v20 }
 0x393   :  { %1568 = vmatpush.msra.mxu3 %v3153_v63  ;;  %1513 = vmatpush.msra.mxu0 %v3203_v5 }
 0x395   :  { %1569 = vmatpush.msra.mxu3 %v3165_v32 }
 0x397   :  { %1570 = vmatpush.msra.mxu3 %v3177_v33 }
 0x399   :  { %1571 = vmatpush.msra.mxu3 %v3189_v19 }
 0x39b   :  { %1572 = vmatpush.msra.mxu3 %v3199_v47 }
 0x39d   :  { %1573 = vmatpush.msra.mxu3 %v3211_v14  ;;  %v3239_v14 = vld [vmem:[#allocation7 + $0x8] sm:$0xff] }
 0x39e   :  { %3512 = vst [vmem:[#allocation36_spill] sm:$0xff] %v3239_v14 }
 0x400   :  { %v1289_v51 = vpop.f32.mrf.mxu0  ;;  %v1309_v60 = vpop.f32.mrf.mxu1 }
 0x401   :  { %v1352_v41 = vadd.f32 %v1289_v51, %v1204_v58  ;;  %v1353_v1 = vadd.f32 %v1309_v60, %v1205_v59  ;;  %v3213_v58 = vld [vmem:[#allocation7 + $0x40] sm:$0xff]  ;;  %v3215_v59 = vld [vmem:[#allocation7 + $0x48] sm:$0xff]  ;;  %v3219_v60 = vld [vmem:[#allocation7 + $0x50] sm:$0xff] }
 0x402   :  { %3510 = vst [vmem:[#allocation18_spill] sm:$0xff] %v3213_v58  ;;  %1514 = vmatpush.msra.mxu0 %v3213_v58  ;;  %1534 = vmatpush.msra.mxu1 %v3215_v59 }
 0x403   :  { %v1965_v10 = vmul.f32 -1.442695, %v1352_v41  ;;  %v1966_v39 = vmul.f32 -1.442695, %v1353_v1  ;;  %3511 = vst [vmem:[#allocation35_spill] sm:$0xff] %v3215_v59  ;;  %v3221_v41 = vld [vmem:[#allocation7 + $0x58] sm:$0xff]  ;;  %1554 = vmatpush.msra.mxu2 %v3219_v60 }
 0x404   :  { %v3225_v1 = vld [vmem:[#allocation7 + $0x20] sm:$0xff]  ;;  %1574 = vmatpush.msra.mxu3 %v3221_v41  ;;  %v3247_v59 = vld [vmem:[#allocation7 + $0x18] sm:$0xff] }
 0x405   :  { %2075 = vpow2.f32 %v1965_v10  ;;  %v3227_v10 = vld [vmem:[#allocation7 + $0x28] sm:$0xff]  ;;  %1515 = vmatpush.msra.mxu0 %v3225_v1  ;;  %3513 = vst [vmem:[#allocation37_spill] sm:$0xff] %v3247_v59 }
 0x406   :  { %2077 = vpow2.f32 %v1966_v39  ;;  %1535 = vmatpush.msra.mxu1 %v3227_v10 }
 0x407   :  { %v1349_v8 = vpop.f32.mrf.mxu3  ;;  %1516 = vmatpush.msra.mxu0 %v3237_v7 }
 0x408   :  { %v1355_v51 = vadd.f32 %v1349_v8, %v1207_v11  ;;  %v3231_v11 = vld [vmem:[#allocation7 + $0x30] sm:$0xff]  ;;  %v3233_v8 = vld [vmem:[#allocation7 + $0x38] sm:$0xff]  ;;  %1536 = vmatpush.msra.mxu1 %v3239_v14 }
 0x409   :  { %1555 = vmatpush.msra.mxu2 %v3231_v11  ;;  %1575 = vmatpush.msra.mxu3 %v3233_v8 }
 0x40a   :  { %v1967_v39 = vmul.f32 -1.442695, %v1355_v51  ;;  %v3245_v51 = vld [vmem:[#allocation7 + $0x10] sm:$0xff]  ;;  %1730 = vmatpush.msrb.mxu0 %v3061_v3  ;;  %1750 = vmatpush.msrb.mxu1 %v3063_v16 }
 0x40b   :  { %v2076_v9 = vpop.eup %2075  ;;  %1556 = vmatpush.msra.mxu2 %v3245_v51  ;;  %1576 = vmatpush.msra.mxu3 %v3247_v59 }
 0x40c   :  { %v2078_v6 = vpop.eup %2077  ;;  %v3241_v5 = vadd.f32 1.0, %v2076_v9  ;;  %2079 = vpow2.f32 %v1967_v39  ;;  %v1206_v9 = vld [vmem:[#allocation4 + $0xb0] sm:$0xff]  ;;  %1731 = vmatpush.msrb.mxu0 %v3073_v17  ;;  %1751 = vmatpush.msrb.mxu1 %v3075_v18 }
 0x40d   :  { %v3249_v58 = vadd.f32 1.0, %v2078_v6  ;;  %v1329_v6 = vpop.f32.mrf.mxu2  ;;  %1770 = vmatpush.msrb.mxu2 %v3065_v22  ;;  %1790 = vmatpush.msrb.mxu3 %v3069_v15 }
 0x40e   :  { %2081 = vrcp.f32 %v3241_v5  ;;  %v1354_v59 = vadd.f32 %v1329_v6, %v1206_v9  ;;  %1732 = vmatpush.msrb.mxu0 %v3085_v26  ;;  %1752 = vmatpush.msrb.mxu1 %v3087_v0  ;;  %v1369_v0 = vand.u32 2147483647, %v3241_v5  ;;  %vm1365_vm11 = vweird.f32 %v3241_v5 }
 0x40f   :  { %2083 = vrcp.f32 %v3249_v58  ;;  %1771 = vmatpush.msrb.mxu2 %v3077_v21  ;;  %1791 = vmatpush.msrb.mxu3 %v3081_v25  ;;  %v1371_v21 = vand.u32 2147483648, %v3241_v5  ;;  %v1390_v25 = vand.u32 2147483648, %v3249_v58  ;;  %vm1384_vm12 = vweird.f32 %v3249_v58 }
 0x410   :  { %1733 = vmatpush.msrb.mxu0 %v3097_v28  ;;  %1753 = vmatpush.msrb.mxu1 %v3099_v29  ;;  %vm1370_vm15 = vcmp.eq.f32.partialorder %v1369_v0, 8.507059e+37 }
 0x411   :  { %1772 = vmatpush.msrb.mxu2 %v3089_v62  ;;  %1792 = vmatpush.msrb.mxu3 %v3093_v27  ;;  %v1388_v27 = vand.u32 2147483647, %v3249_v58 }
 0x412   :  { %v2080_v39 = vpop.eup %2079  ;;  %1734 = vmatpush.msrb.mxu0 %v3109_v34  ;;  %1754 = vmatpush.msrb.mxu1 %v3111_v35  ;;  %v1391_v35 = vor.u32 1.1754944e-38, %v1390_v25 }
 0x413   :  { %v3265_v14 = vadd.f32 1.0, %v2080_v39  ;;  %1773 = vmatpush.msrb.mxu2 %v3101_v30  ;;  %1793 = vmatpush.msrb.mxu3 %v3105_v31  ;;  %v1372_v30 = vor.u32 1.1754944e-38, %v1371_v21  ;;  %vm1389_vm0 = vcmp.eq.f32.partialorder %v1388_v27, 8.507059e+37 }
 0x414   :  { %v2082_v3 = vpop.eup %2081  ;;  %1735 = vmatpush.msrb.mxu0 %v3121_v40  ;;  %1755 = vmatpush.msrb.mxu1 %v3123_v43 }
 0x415   :  { %v2084_v16 = vpop.eup %2083  ;;  %v1361_v22 = vmul.f32 %v2082_v3, %v3241_v5  ;;  %2085 = vrcp.f32 %v3265_v14  ;;  %vm1366_vm9 = vweird.f32 %v2082_v3  ;;  %1774 = vmatpush.msrb.mxu2 %v3113_v36  ;;  %1794 = vmatpush.msrb.mxu3 %v3117_v37  ;;  %vm1404_vm3 = vweird.f32 %v3265_v14  ;;  %v1433_v5 = vld [vmem:[#allocation4 + $0xc0] sm:$0xff] }
 0x416   :  { %v1380_v15 = vmul.f32 %v2084_v16, %v3249_v58  ;;  %2087 = vtanh.f32 %v1354_v59  ;;  %vm1385_vm10 = vweird.f32 %v2084_v16  ;;  %vm1367_vm13 = vmor %vm1365_vm11, %vm1366_vm9  ;;  %1736 = vmatpush.msrb.mxu0 %v3133_v46  ;;  %1756 = vmatpush.msrb.mxu1 %v3135_v49  ;;  %v1425_v49 = vpop.permute.xlu2 %1424 }
 0x417   :  { %v1362_v17 = vsub.f32 1.0, %v1361_v22  ;;  %1775 = vmatpush.msrb.mxu2 %v3125_v44  ;;  %1795 = vmatpush.msrb.mxu3 %v3129_v45  ;;  %vm1386_vm14 = vmor %vm1384_vm12, %vm1385_vm10  ;;  %vm1426_vm1 = vcmp.eq.s32.totalorder %v1425_v49, 1 }
 0x418   :  { %v1381_v18 = vsub.f32 1.0, %v1380_v15  ;;  %1737 = vmatpush.msrb.mxu0 %v3145_v53  ;;  %1757 = vmatpush.msrb.mxu1 %v3147_v55 }
 0x419   :  { %v1363_v26 = vmul.f32 %v2082_v3, %v1362_v17  ;;  %1776 = vmatpush.msrb.mxu2 %v3137_v50  ;;  %1796 = vmatpush.msrb.mxu3 %v3141_v52 }
 0x41a   :  { %v1382_v62 = vmul.f32 %v2084_v16, %v1381_v18  ;;  %1738 = vmatpush.msrb.mxu0 %v3157_v61  ;;  %1758 = vmatpush.msrb.mxu1 %v3159_v2  ;;  %v1408_v61 = vand.u32 2147483647, %v3265_v14 }
 0x41b   :  { %v3290_v28 = vpop.eup %2085  ;;  %v1364_v29 = vadd.f32 %v2082_v3, %v1363_v26  ;;  %1777 = vmatpush.msrb.mxu2 %v3149_v57  ;;  %1797 = vmatpush.msrb.mxu3 %v3153_v63  ;;  %v1410_v57 = vand.u32 2147483648, %v3265_v14 }
 0x41c   :  { %v1383_v31 = vadd.f32 %v2084_v16, %v1382_v62  ;;  %v1400_v34 = vmul.f32 %v3290_v28, %v3265_v14  ;;  %v2088_v37 = vpop.eup %2087  ;;  %1739 = vmatpush.msrb.mxu0 %v3169_v48  ;;  %1759 = vmatpush.msrb.mxu1 %v3171_v12  ;;  %vm1405_vm2 = vweird.f32 %v3290_v28  ;;  %vm1409_vm5 = vcmp.eq.f32.partialorder %v1408_v61, 8.507059e+37  ;;  %v3516_v48 = vld [vmem:[#allocation33_spill] sm:$0xff]  ;;  %v3517_v12 = vld [vmem:[#allocation34_spill] sm:$0xff]  ;;  %v1434_v14 = vld [vmem:[#allocation4 + $0xc8] sm:$0xff]  ;;  %v1654_v61 = vpop.permute.xlu0 %1653 }
 0x41d   :  { %v1368_v36 = vsel %vm1367_vm13, %v2082_v3, %v1364_v29  ;;  %1778 = vmatpush.msrb.mxu2 %v3161_v38  ;;  %1798 = vmatpush.msrb.mxu3 %v3165_v32  ;;  %vm1406_vm4 = vmor %vm1404_vm3, %vm1405_vm2  ;;  %v1411_v2 = vor.u32 1.1754944e-38, %v1410_v57  ;;  %v3514_v38 = vld [vmem:[#allocation31_spill] sm:$0xff]  ;;  %v3515_v32 = vld [vmem:[#allocation32_spill] sm:$0xff] }
 0x41e   :  { %v1373_v40 = vsel %vm1370_vm15, %v1372_v30, %v1368_v36  ;;  %v1387_v43 = vsel %vm1386_vm14, %v2084_v16, %v1383_v31  ;;  %v1401_v44 = vsub.f32 1.0, %v1400_v34  ;;  %1740 = vmatpush.msrb.mxu0 %v3181_v13  ;;  %1760 = vmatpush.msrb.mxu1 %v3183_v4  ;;  %v3518_v13 = vld [vmem:[#allocation18_spill] sm:$0xff]  ;;  %v3519_v4 = vld [vmem:[#allocation35_spill] sm:$0xff]  ;;  %v1435_v16 = vld [vmem:[#allocation4 + $0xd0] sm:$0xff]  ;;  %vm1655_vm14 = vcmp.eq.s32.totalorder %v1654_v61, 1 }
 0x41f   :  { %v1392_v45 = vsel %vm1389_vm0, %v1391_v35, %v1387_v43  ;;  %v1415_v46 = vmul.f32 %v2088_v37, %v1373_v40  ;;  %1779 = vmatpush.msrb.mxu2 %v3173_v42  ;;  %1799 = vmatpush.msrb.mxu3 %v3177_v33 }
 0x420   :  { %v1414_v50 = vmul.f32 %v1392_v45, %v3050_v56  ;;  %v1402_v52 = vmul.f32 %v3290_v28, %v1401_v44  ;;  %1741 = vmatpush.msrb.mxu0 %v3191_v20  ;;  %1761 = vmatpush.msrb.mxu1 %v3195_v23 }
 0x421   :  { %1780 = vmatpush.msrb.mxu2 %v3187_v54  ;;  %1800 = vmatpush.msrb.mxu3 %v3189_v19  ;;  %v3520_v19 = vld [vmem:[#allocation30_spill] sm:$0xff] }
 0x422   :  { %v1416_v53 = vadd.f32 %v1415_v46, %v1414_v50  ;;  %v1403_v55 = vadd.f32 %v3290_v28, %v1402_v52  ;;  %1742 = vmatpush.msrb.mxu0 %v3514_v38  ;;  %1762 = vmatpush.msrb.mxu1 %v3515_v32 }
 0x423   :  { %1781 = vmatpush.msrb.mxu2 %v3197_v24  ;;  %1801 = vmatpush.msrb.mxu3 %v3199_v47  ;;  %v3521_v24 = vld [vmem:[#allocation36_spill] sm:$0xff]  ;;  %v3522_v47 = vld [vmem:[#allocation37_spill] sm:$0xff] }
 0x424   :  { %2089 = vtanh.f32 %v1416_v53  ;;  %v3323_v63 = vsel %vm1426_vm1, %v1416_v53, %v3050_v56  ;;  %v1407_v56 = vsel %vm1406_vm4, %v3290_v28, %v1403_v55  ;;  %1743 = vmatpush.msrb.mxu0 %v3518_v13  ;;  %1763 = vmatpush.msrb.mxu1 %v3519_v4 }
 0x425   :  { %1782 = vmatpush.msrb.mxu2 %v3516_v48  ;;  %1802 = vmatpush.msrb.mxu3 %v3517_v12  ;;  %v1412_v33 = vsel %vm1409_vm5, %v1411_v2, %v1407_v56 }
 0x426   :  { %1744 = vmatpush.msrb.mxu0 %v3225_v1  ;;  %1764 = vmatpush.msrb.mxu1 %v3227_v10 }
 0x427   :  { %1783 = vmatpush.msrb.mxu2 %v3219_v60  ;;  %1803 = vmatpush.msrb.mxu3 %v3221_v41 }
 0x428   :  { %1745 = vmatpush.msrb.mxu0 %v3237_v7  ;;  %1765 = vmatpush.msrb.mxu1 %v3521_v24 }
 0x429   :  { %1784 = vmatpush.msrb.mxu2 %v3231_v11  ;;  %1804 = vmatpush.msrb.mxu3 %v3233_v8  ;;  %v1436_v11 = vld [vmem:[#allocation4 + $0xd8] sm:$0xff] }
 0x42a   :  { %v2090_v42 = vpop.eup %2089 }
 0x42b   :  { %v1418_v54 = vmul.f32 %v2090_v42, %v1412_v33  ;;  %1785 = vmatpush.msrb.mxu2 %v3245_v51  ;;  %1805 = vmatpush.msrb.mxu3 %v3522_v47  ;;  %v1663_v47 = vld [vmem:[#allocation4 + $0xe8] sm:$0xff] }
 0x42d   :  { %v3348_v20 = vsel %vm1426_vm1, %v1418_v54, %v3520_v19  ;;  %v1429_v23 = vsel %vm1426_vm1, %v1418_v54, 0.0 }
 0x42e   :  { %1431 = vst [vmem:[#allocation9 + $0x28] sm:$0xff] %v1429_v23  ;;  %1517 = vmatmul.f32.vlgmr.msra.gmra.mxu0 %v3348_v20  ;;  %1537 = vmatmul.f32.vlgmr.msra.gmra.mxu1 %v3348_v20 }
 0x42f   :  { %1557 = vmatmul.f32.vlgmr.msra.gmra.mxu2 %v3348_v20  ;;  %1577 = vmatmul.f32.vlgmr.msra.gmra.mxu3 %v3348_v20 }
 0x4ab   :  { %v1518_v58 = vpop.f32.mrf.mxu0  ;;  %v1538_v59 = vpop.f32.mrf.mxu1 }
 0x4ac   :  { %v1581_v60 = vadd.f32 %v1518_v58, %v1433_v5  ;;  %v1582_v41 = vadd.f32 %v1538_v59, %v1434_v14 }
 0x4ae   :  { %v1969_v1 = vmul.f32 -1.442695, %v1581_v60  ;;  %v1970_v10 = vmul.f32 -1.442695, %v1582_v41  ;;  %v1665_v41 = vld [vmem:[#allocation4 + $0xf8] sm:$0xff] }
 0x4b0   :  { %2091 = vpow2.f32 %v1969_v1 }
 0x4b1   :  { %2093 = vpow2.f32 %v1970_v10 }
 0x4b2   :  { %v1578_v8 = vpop.f32.mrf.mxu3  ;;  %v1558_v22 = vpop.f32.mrf.mxu2 }
 0x4b3   :  { %v1584_v9 = vadd.f32 %v1578_v8, %v1436_v11  ;;  %v1583_v21 = vadd.f32 %v1558_v22, %v1435_v16 }
 0x4b5   :  { %v1971_v7 = vmul.f32 -1.442695, %v1584_v9 }
 0x4b6   :  { %v2092_v6 = vpop.eup %2091 }
 0x4b7   :  { %v2094_v39 = vpop.eup %2093  ;;  %v1588_v3 = vadd.f32 1.0, %v2092_v6  ;;  %2095 = vpow2.f32 %v1971_v7 }
 0x4b8   :  { %v1607_v51 = vadd.f32 1.0, %v2094_v39  ;;  %v1664_v39 = vld [vmem:[#allocation4 + $0xf0] sm:$0xff] }
 0x4b9   :  { %2097 = vrcp.f32 %v1588_v3  ;;  %v1600_v28 = vand.u32 2147483648, %v1588_v3  ;;  %v1598_v31 = vand.u32 2147483647, %v1588_v3  ;;  %vm1594_vm8 = vweird.f32 %v1588_v3 }
 0x4ba   :  { %2099 = vrcp.f32 %v1607_v51  ;;  %v1619_v29 = vand.u32 2147483648, %v1607_v51  ;;  %v1617_v35 = vand.u32 2147483647, %v1607_v51  ;;  %vm1613_vm9 = vweird.f32 %v1607_v51 }
 0x4bb   :  { %v1601_v40 = vor.u32 1.1754944e-38, %v1600_v28  ;;  %vm1599_vm12 = vcmp.eq.f32.partialorder %v1598_v31, 8.507059e+37 }
 0x4bc   :  { %v1620_v45 = vor.u32 1.1754944e-38, %v1619_v29  ;;  %vm1618_vm13 = vcmp.eq.f32.partialorder %v1617_v35, 8.507059e+37 }
 0x4bd   :  { %v2096_v15 = vpop.eup %2095 }
 0x4be   :  { %v1627_v17 = vadd.f32 1.0, %v2096_v15 }
 0x4bf   :  { %v2098_v18 = vpop.eup %2097 }
 0x4c0   :  { %v2100_v25 = vpop.eup %2099  ;;  %v1590_v26 = vmul.f32 %v2098_v18, %v1588_v3  ;;  %2101 = vrcp.f32 %v1627_v17  ;;  %vm1595_vm6 = vweird.f32 %v2098_v18  ;;  %v1639_v48 = vand.u32 2147483648, %v1627_v17 }
 0x4c1   :  { %v1609_v0 = vmul.f32 %v2100_v25, %v1607_v51  ;;  %2103 = vtanh.f32 %v1583_v21  ;;  %vm1614_vm7 = vweird.f32 %v2100_v25  ;;  %vm1596_vm10 = vmor %vm1594_vm8, %vm1595_vm6  ;;  %vm1633_vm0 = vweird.f32 %v1627_v17 }
 0x4c2   :  { %v1591_v62 = vsub.f32 1.0, %v1590_v26  ;;  %vm1615_vm11 = vmor %vm1613_vm9, %vm1614_vm7  ;;  %v1637_v42 = vand.u32 2147483647, %v1627_v17  ;;  %v1640_v13 = vor.u32 1.1754944e-38, %v1639_v48 }
 0x4c3   :  { %v1610_v27 = vsub.f32 1.0, %v1609_v0 }
 0x4c4   :  { %v1592_v30 = vmul.f32 %v2098_v18, %v1591_v62  ;;  %vm1638_vm2 = vcmp.eq.f32.partialorder %v1637_v42, 8.507059e+37 }
 0x4c5   :  { %v1611_v34 = vmul.f32 %v2100_v25, %v1610_v27 }
 0x4c6   :  { %v2102_v36 = vpop.eup %2101  ;;  %v1593_v37 = vadd.f32 %v2098_v18, %v1592_v30 }
 0x4c7   :  { %v1612_v43 = vadd.f32 %v2100_v25, %v1611_v34  ;;  %v1629_v44 = vmul.f32 %v2102_v36, %v1627_v17  ;;  %v2104_v49 = vpop.eup %2103  ;;  %vm1634_vm15 = vweird.f32 %v2102_v36 }
 0x4c8   :  { %v1597_v46 = vsel %vm1596_vm10, %v2098_v18, %v1593_v37  ;;  %vm1635_vm1 = vmor %vm1633_vm0, %vm1634_vm15 }
 0x4c9   :  { %v1602_v50 = vsel %vm1599_vm12, %v1601_v40, %v1597_v46  ;;  %v1616_v52 = vsel %vm1615_vm11, %v2100_v25, %v1612_v43  ;;  %v1630_v53 = vsub.f32 1.0, %v1629_v44 }
 0x4ca   :  { %v1621_v55 = vsel %vm1618_vm13, %v1620_v45, %v1616_v52  ;;  %v1644_v57 = vmul.f32 %v2104_v49, %v1602_v50 }
 0x4cb   :  { %v1643_v56 = vmul.f32 %v1621_v55, %v3323_v63  ;;  %v1631_v2 = vmul.f32 %v2102_v36, %v1630_v53  ;;  %v1883_v53 = vpop.permute.xlu1 %1882 }
 0x4cc   :  { %vm1884_vm11 = vcmp.eq.s32.totalorder %v1883_v53, 1 }
 0x4cd   :  { %v1645_v38 = vadd.f32 %v1644_v57, %v1643_v56  ;;  %v1632_v32 = vadd.f32 %v2102_v36, %v1631_v2 }
 0x4cf   :  { %2105 = vtanh.f32 %v1645_v38  ;;  %v3364_v12 = vsel %vm1655_vm14, %v1645_v38, %v3323_v63  ;;  %v1636_v33 = vsel %vm1635_vm1, %v2102_v36, %v1632_v32  ;;  %v1662_v63 = vld [vmem:[#allocation4 + $0xe0] sm:$0xff] }
 0x4d0   :  { %v1641_v54 = vsel %vm1638_vm2, %v1640_v13, %v1636_v33 }
 0x4d5   :  { %v2106_v4 = vpop.eup %2105 }
 0x4d6   :  { %v1647_v19 = vmul.f32 %v2106_v4, %v1641_v54 }
 0x4d8   :  { %v3368_v23 = vsel %vm1655_vm14, %v1647_v19, %v3348_v20  ;;  %v1658_v24 = vsel %vm1655_vm14, %v1647_v19, 0.0 }
 0x4d9   :  { %1660 = vst [vmem:[#allocation9 + $0x30] sm:$0xff] %v1658_v24  ;;  %1746 = vmatmul.f32.vlgmr.msrb.gmra.mxu0 %v3368_v23  ;;  %1766 = vmatmul.f32.vlgmr.msrb.gmra.mxu1 %v3368_v23 }
 0x4da   :  { %1786 = vmatmul.f32.vlgmr.msrb.gmra.mxu2 %v3368_v23  ;;  %1806 = vmatmul.f32.vlgmr.msrb.gmra.mxu3 %v3368_v23 }
 0x556   :  { %v1747_v5 = vpop.f32.mrf.mxu0  ;;  %v1767_v14 = vpop.f32.mrf.mxu1 }
 0x557   :  { %v1810_v58 = vadd.f32 %v1747_v5, %v1662_v63  ;;  %v1811_v59 = vadd.f32 %v1767_v14, %v1663_v47 }
 0x559   :  { %v1973_v60 = vmul.f32 -1.442695, %v1810_v58  ;;  %v1974_v20 = vmul.f32 -1.442695, %v1811_v59 }
 0x55b   :  { %2107 = vpow2.f32 %v1973_v60 }
 0x55c   :  { %2109 = vpow2.f32 %v1974_v20 }
 0x55d   :  { %v1807_v1 = vpop.f32.mrf.mxu3  ;;  %v1787_v3 = vpop.f32.mrf.mxu2 }
 0x55e   :  { %v1813_v10 = vadd.f32 %v1807_v1, %v1665_v41  ;;  %v1812_v15 = vadd.f32 %v1787_v3, %v1664_v39 }
 0x560   :  { %v1975_v11 = vmul.f32 -1.442695, %v1813_v10 }
 0x561   :  { %v2108_v8 = vpop.eup %2107 }
 0x562   :  { %v2110_v9 = vpop.eup %2109  ;;  %v1817_v7 = vadd.f32 1.0, %v2108_v8  ;;  %2111 = vpow2.f32 %v1975_v11 }
 0x563   :  { %v1836_v6 = vadd.f32 1.0, %v2110_v9 }
 0x564   :  { %2113 = vrcp.f32 %v1817_v7  ;;  %v1829_v0 = vand.u32 2147483648, %v1817_v7  ;;  %v1827_v28 = vand.u32 2147483647, %v1817_v7  ;;  %vm1823_vm5 = vweird.f32 %v1817_v7 }
 0x565   :  { %2115 = vrcp.f32 %v1836_v6  ;;  %v1848_v62 = vand.u32 2147483648, %v1836_v6  ;;  %v1846_v30 = vand.u32 2147483647, %v1836_v6  ;;  %vm1842_vm6 = vweird.f32 %v1836_v6 }
 0x566   :  { %v1830_v35 = vor.u32 1.1754944e-38, %v1829_v0  ;;  %vm1828_vm9 = vcmp.eq.f32.partialorder %v1827_v28, 8.507059e+37 }
 0x567   :  { %v1849_v40 = vor.u32 1.1754944e-38, %v1848_v62  ;;  %vm1847_vm10 = vcmp.eq.f32.partialorder %v1846_v30, 8.507059e+37 }
 0x568   :  { %v2112_v51 = vpop.eup %2111 }
 0x569   :  { %v1856_v16 = vadd.f32 1.0, %v2112_v51 }
 0x56a   :  { %v2114_v22 = vpop.eup %2113 }
 0x56b   :  { %v2116_v17 = vpop.eup %2115  ;;  %v1819_v18 = vmul.f32 %v2114_v22, %v1817_v7  ;;  %2117 = vrcp.f32 %v1856_v16  ;;  %vm1824_vm3 = vweird.f32 %v2114_v22  ;;  %v1868_v2 = vand.u32 2147483648, %v1856_v16 }
 0x56c   :  { %v1838_v21 = vmul.f32 %v2116_v17, %v1836_v6  ;;  %2119 = vtanh.f32 %v1812_v15  ;;  %vm1843_vm4 = vweird.f32 %v2116_v17  ;;  %vm1825_vm7 = vmor %vm1823_vm5, %vm1824_vm3  ;;  %vm1862_vm13 = vweird.f32 %v1856_v16 }
 0x56d   :  { %v1820_v25 = vsub.f32 1.0, %v1819_v18  ;;  %vm1844_vm8 = vmor %vm1842_vm6, %vm1843_vm4  ;;  %v1866_v32 = vand.u32 2147483647, %v1856_v16  ;;  %v1869_v42 = vor.u32 1.1754944e-38, %v1868_v2 }
 0x56e   :  { %v1839_v26 = vsub.f32 1.0, %v1838_v21 }
 0x56f   :  { %v1821_v27 = vmul.f32 %v2114_v22, %v1820_v25  ;;  %vm1867_vm15 = vcmp.eq.f32.partialorder %v1866_v32, 8.507059e+37 }
 0x570   :  { %v1840_v29 = vmul.f32 %v2116_v17, %v1839_v26 }
 0x571   :  { %v2118_v31 = vpop.eup %2117  ;;  %v1822_v34 = vadd.f32 %v2114_v22, %v1821_v27 }
 0x572   :  { %v1841_v36 = vadd.f32 %v2116_v17, %v1840_v29  ;;  %v1858_v37 = vmul.f32 %v2118_v31, %v1856_v16  ;;  %v2120_v44 = vpop.eup %2119  ;;  %vm1863_vm12 = vweird.f32 %v2118_v31 }
 0x573   :  { %v1826_v43 = vsel %vm1825_vm7, %v2114_v22, %v1822_v34  ;;  %vm1864_vm14 = vmor %vm1862_vm13, %vm1863_vm12 }
 0x574   :  { %v1831_v45 = vsel %vm1828_vm9, %v1830_v35, %v1826_v43  ;;  %v1845_v46 = vsel %vm1844_vm8, %v2116_v17, %v1841_v36  ;;  %v1859_v49 = vsub.f32 1.0, %v1858_v37 }
 0x575   :  { %v1850_v50 = vsel %vm1847_vm10, %v1849_v40, %v1845_v46  ;;  %v1873_v52 = vmul.f32 %v2120_v44, %v1831_v45 }
 0x576   :  { %v1872_v55 = vmul.f32 %v1850_v50, %v3364_v12  ;;  %v1860_v57 = vmul.f32 %v2118_v31, %v1859_v49 }
 0x578   :  { %v1874_v61 = vadd.f32 %v1873_v52, %v1872_v55  ;;  %v1861_v56 = vadd.f32 %v2118_v31, %v1860_v57 }
 0x57a   :  { %2121 = vtanh.f32 %v1874_v61  ;;  %v1886_v38 = vsel %vm1884_vm11, %v1874_v61, %v3364_v12  ;;  %v1865_v48 = vsel %vm1864_vm14, %v2118_v31, %v1861_v56 }
 0x57b   :  { %1893 = vst [vmem:[#allocation12] sm:$0xff] %v1886_v38  ;;  %v1870_v33 = vsel %vm1867_vm15, %v1869_v42, %v1865_v48 }
 0x580   :  { %v2122_v12 = vpop.eup %2121 }
 0x581   :  { %v1876_v13 = vmul.f32 %v2122_v12, %v1870_v33 }
 0x583   :  { %v1885_v4 = vsel %vm1884_vm11, %v1876_v13, %v3368_v23  ;;  %v1887_v54 = vsel %vm1884_vm11, %v1876_v13, 0.0 }
 0x584   :  { %1889 = vst [vmem:[#allocation9 + $0x38] sm:$0xff] %v1887_v54 }
 0x585   :  { %1892 = vst [vmem:[#allocation10] sm:$0xff] %v1885_v4  ;;  %1906 = dma.vmem_to_hbm [thread:$0]  %s1899_s7, 1024, %s1901_s10, [#allocation6], %s2261_s3, %s2261_s3, %s2262_s4  }
 0x586   :  { %1917 = dma.vmem_to_hbm [thread:$0]  %s1913_s12, 128, %s1915_s15, [#allocation11]  }
 0x587   :  { %1928 = dma.vmem_to_hbm [thread:$0]  %s1924_s17, 128, %s1926_s20, [#allocation11]  }
 0x588   :  { %2248 = dma.done.wait [#allocation6], 1024  }
 0x589   :  { %2249 = vsyncadd [#allocation6], 4294966272 }
 0x58a   :  { %2250 = dma.done.wait [#allocation11], 256  }
 0x58b   :  { %2251 = vsyncadd [#allocation11], 4294967040 }
 0x58c   :  { %1941 = vsyncpa [#allocation5], 1 }
 0x58d   :  { %1942 = vsyncpa [#allocation8], 1 }
 0x58e   :  { %1943 = vsyncpa [#allocation6], 1 }
 0x58f   :  { %1944 = vsyncpa [#allocation11], 1 }

</bundles_post_ra>
